<compile_context>
chip_gen: v7x
topology: tpu7x:2x2x1
jax: 0.10.0
libtpu: 0.0.40
codegen_flags: <defaults>
</compile_context>

<pallas_src>
import functools

import jax
import jax.numpy as jnp
import numpy as np
from jax.experimental import pallas as pl
from jax.experimental.pallas import tpu as pltpu

# Coefficient scratch layout (first axis of the (24, TILE_B, 1) scratch):
#   0-8  : pred_R (row-major)      9-17 : c_R_w (row-major)
#   18-20: pred_x (x, y, z)        21-23: target_x (x, y, z)
_N_COEF = 24


# ----------------------------------------------------------------------------
# Kernel
# ----------------------------------------------------------------------------
def _geometric_loss_kernel(pred_x_ref, pred_q_ref, target_x_ref, target_q_ref,
                           c_r_w_ref, w_p_ref, out_ref, coef_ref, acc_ref,
                           *, inv_n):
    """Blocks per (b, n) grid step:
         pred_x/target_x : (TB, 3)    pred_q/target_q : (TB, 4)
         c_R_w           : (TB, 9)    w_P             : (3, TB, TN)
         out             : (1, 8, 128)  lane 0 = err_sum, 1 = loss_x_sum,
                                        2 = loss_q_sum (sums over the B-tile)
       Scratch:
         coef : (24, TB, 1) per-sample coefficients (filled at n == 0)
         acc  : (TB, 1)     per-sample L1 partial sums over points
    """
    f32 = jnp.float32
    n = pl.program_id(1)
    n_last = pl.num_programs(1) - 1

    # ---------------- prologue: once per batch tile (n == 0) -----------------
    @pl.when(n == 0)
    def _prologue():
        pq = pred_q_ref[...].astype(f32)                             # (TB, 4)
        qn = pq / jnp.maximum(
            jnp.sqrt(jnp.sum(pq * pq, axis=1, keepdims=True)), 1e-12)
        # Conjugate: q = (w, -x, -y, -z) — direct slice negation, no iota/select.
        qw = qn[:, 0:1]
        qx = -qn[:, 1:2]
        qy = -qn[:, 2:3]
        qz = -qn[:, 3:4]
        # Hamilton quaternion -> rotation matrix entries, each (TB, 1).
        coef_ref[0] = 1.0 - 2.0 * (qy * qy + qz * qz)
        coef_ref[1] = 2.0 * (qx * qy - qw * qz)
        coef_ref[2] = 2.0 * (qx * qz + qw * qy)
        coef_ref[3] = 2.0 * (qx * qy + qw * qz)
        coef_ref[4] = 1.0 - 2.0 * (qx * qx + qz * qz)
        coef_ref[5] = 2.0 * (qy * qz - qw * qx)
        coef_ref[6] = 2.0 * (qx * qz - qw * qy)
        coef_ref[7] = 2.0 * (qy * qz + qw * qx)
        coef_ref[8] = 1.0 - 2.0 * (qx * qx + qy * qy)
        crw = c_r_w_ref[...].astype(f32)                             # (TB, 9)
        for i in range(9):
            coef_ref[9 + i] = crw[:, i:i + 1]
        px = pred_x_ref[...].astype(f32)                             # (TB, 3)
        tx = target_x_ref[...].astype(f32)
        for i in range(3):
            coef_ref[18 + i] = px[:, i:i + 1]
            coef_ref[21 + i] = tx[:, i:i + 1]
        acc_ref[...] = jnp.zeros_like(acc_ref)

    # ---------------- per-N-tile reprojection error --------------------------
    wp0 = w_p_ref[0].astype(f32)                                     # (TB, TN)
    wp1 = w_p_ref[1].astype(f32)
    wp2 = w_p_ref[2].astype(f32)

    r00, r01, r02 = coef_ref[0], coef_ref[1], coef_ref[2]
    r10, r11, r12 = coef_ref[3], coef_ref[4], coef_ref[5]
    r20, r21, r22 = coef_ref[6], coef_ref[7], coef_ref[8]
    c00, c01, c02 = coef_ref[9], coef_ref[10], coef_ref[11]
    c10, c11, c12 = coef_ref[12], coef_ref[13], coef_ref[14]
    c20, c21, c22 = coef_ref[15], coef_ref[16], coef_ref[17]
    px0, px1, px2 = coef_ref[18], coef_ref[19], coef_ref[20]
    tx0, tx1, tx2 = coef_ref[21], coef_ref[22], coef_ref[23]

    dp0 = wp0 - px0
    dp1 = wp1 - px1
    dp2 = wp2 - px2
    dt0 = wp0 - tx0
    dt1 = wp1 - tx1
    dt2 = wp2 - tx2

    # pred_R @ (P - pred_x): 9 VPU multiply-adds (a K=3 matmul would run the
    # MXU >97% padded).
    p0 = r00 * dp0 + r01 * dp1 + r02 * dp2
    p1 = r10 * dp0 + r11 * dp1 + r12 * dp2
    p2 = r20 * dp0 + r21 * dp1 + r22 * dp2
    # c_R_w @ (P - target_x)
    t0 = c00 * dt0 + c01 * dt1 + c02 * dt2
    t1 = c10 * dt0 + c11 * dt1 + c12 * dt2
    t2 = c20 * dt0 + c21 * dt1 + c22 * dt2

    # Perspective divide: 2 reciprocals + 4 multiplies instead of 4 full-width
    # divides; inf/NaN propagation matches plain division.
    rp = pl.reciprocal(p2, approx=False)
    rt = pl.reciprocal(t2, approx=False)
    l1 = jnp.abs(p0 * rp - t0 * rt) + jnp.abs(p1 * rp - t1 * rt)     # (TB, TN)
    acc_ref[...] += jnp.sum(l1, axis=1, keepdims=True)

    # ---------------- finalize: once per batch tile (last N tile) ------------
    @pl.when(n == n_last)
    def _finalize():
        # Per-sample mean over ALL points, then NaN -> 0 (applied to the full
        # mean, not per tile, matching the reference's nan_to_num).
        sample_err = acc_ref[...] * inv_n                            # (TB, 1)
        sample_err = jnp.where(jnp.isnan(sample_err), 0.0, sample_err)
        err_sum = jnp.sum(sample_err, axis=0, keepdims=True)         # (1, 1)

        px = pred_x_ref[...].astype(jnp.float32)
        tx = target_x_ref[...].astype(jnp.float32)
        dx = px - tx
        lx_sum = jnp.sum(jnp.sqrt(jnp.sum(dx * dx, axis=1, keepdims=True)),
                         axis=0, keepdims=True)                      # (1, 1)

        pq = pred_q_ref[...].astype(jnp.float32)
        tq = target_q_ref[...].astype(jnp.float32)
        qn = pq / jnp.maximum(
            jnp.sqrt(jnp.sum(pq * pq, axis=1, keepdims=True)), 1e-12)
        dqw = qn[:, 0:1] - tq[:, 0:1]      # conjugated q minus target_q
        dqx = -qn[:, 1:2] - tq[:, 1:2]
        dqy = -qn[:, 2:3] - tq[:, 2:3]
        dqz = -qn[:, 3:4] - tq[:, 3:4]
        lq_sum = jnp.sum(
            jnp.sqrt(dqw * dqw + dqx * dqx + dqy * dqy + dqz * dqz),
            axis=0, keepdims=True)                                   # (1, 1)

        # Single lane-dense (1, 8, 128) store.
        lane = jax.lax.broadcasted_iota(jnp.int32, out_ref.shape, 2)
        res = jnp.where(lane == 0, err_sum,
              jnp.where(lane == 1, lx_sum,
              jnp.where(lane == 2, lq_sum, 0.0)))
        out_ref[...] = res.astype(out_ref.dtype)


# ----------------------------------------------------------------------------
# Wrapper
# ----------------------------------------------------------------------------
def _pick_tile(dim, quantum, preferred):
    """Largest preferred tile that divides `dim`; falls back to the full dim
    when `dim` is not quantum-aligned (Pallas allows full-extent blocks)."""
    if dim % quantum != 0:
        return dim
    for t in preferred:
        if dim % t == 0:
            return t
    return quantum


def geometric_loss(pred_x, pred_q, target_x, target_q, c_R_w, w_P_t):
    """Pallas TPU implementation of GeometricLoss.forward.

    pred_x (B,3), pred_q (B,4), target_x (B,3,1) or (B,3), target_q (B,4),
    c_R_w (B,3,3), w_P_t (3,B,N)  -- world points in the points-last layout
    (produce it directly upstream; see `geometric_loss_bn3` for the original
    (B,N,3) interface, which costs an extra HBM pass).
    Returns (batch_error, loss_x, loss_q) as f32 scalars.
    """
    f32 = jnp.float32
    B = pred_x.shape[0]
    N = w_P_t.shape[2]

    target_x_sq = target_x.reshape(B, 3)              # .squeeze()
    c_r_w_flat = c_R_w.reshape(B, 9)

    tile_b = _pick_tile(B, 8, (64, 32, 16, 8))
    tile_n = _pick_tile(N, 128, (4096, 2048, 1024, 512, 256, 128))
    grid = (B // tile_b, N // tile_n)

    kernel = functools.partial(_geometric_loss_kernel, inv_n=1.0 / float(N))

    def small_spec(width):
        return pl.BlockSpec((tile_b, width), lambda b, n: (b, 0))

    cost = pl.CostEstimate(
        flops=int(60 * B * N),
        transcendentals=int(2 * B * N + 2 * B),
        bytes_accessed=int(w_P_t.dtype.itemsize * 3 * B * N
                           + 4 * 23 * B + 4 * 8 * 128 * grid[0]))

    out = pl.pallas_call(
        kernel,
        out_shape=jax.ShapeDtypeStruct((grid[0], 8, 128), f32),
        grid_spec=pltpu.PrefetchScalarGridSpec(
            num_scalar_prefetch=0,
            grid=grid,
            in_specs=[
                small_spec(3),                                   # pred_x
                small_spec(4),                                   # pred_q
                small_spec(3),                                   # target_x
                small_spec(4),                                   # target_q
                small_spec(9),                                   # c_R_w
                pl.BlockSpec((3, tile_b, tile_n), lambda b, n: (0, b, n)),
            ],
            out_specs=pl.BlockSpec((1, 8, 128), lambda b, n: (b, 0, 0)),
            scratch_shapes=[
                pltpu.VMEM((_N_COEF, tile_b, 1), f32),   # per-sample coefficients
                pltpu.VMEM((tile_b, 1), f32),            # per-sample L1 accumulator
            ]),
        compiler_params=pltpu.CompilerParams(
            dimension_semantics=("parallel", "arbitrary"),
            vmem_limit_bytes=32 * 1024 * 1024),
        cost_estimate=cost,
    )(pred_x, pred_q, target_x_sq, target_q, c_r_w_flat, w_P_t)

    inv_b = 1.0 / float(B)
    batch_error = jnp.sum(out[:, 0, 0]) * inv_b
    loss_x = jnp.sum(out[:, 0, 1]) * inv_b
    loss_q = jnp.sum(out[:, 0, 2]) * inv_b
    return batch_error, loss_x, loss_q


def geometric_loss_bn3(pred_x, pred_q, target_x, target_q, c_R_w, w_P):
    """Compatibility wrapper for the original (B, N, 3) w_P layout."""
    # TODO(synk): this transpose costs an extra full HBM read+write over w_P;
    # prefer emitting w_P as (3, B, N) upstream and calling geometric_loss.
    return geometric_loss(pred_x, pred_q, target_x, target_q, c_R_w,
                          jnp.transpose(w_P, (2, 0, 1)))


# ----------------------------------------------------------------------------
# Pure-JAX reference (mirrors the PyTorch module) for correctness checking
# ----------------------------------------------------------------------------
def _quat_to_rotmat(q):
    w, x, y, z = q[:, 0], q[:, 1], q[:, 2], q[:, 3]
    return jnp.stack([
        jnp.stack([1 - 2 * (y * y + z * z), 2 * (x * y - w * z), 2 * (x * z + w * y)], axis=-1),
        jnp.stack([2 * (x * y + w * z), 1 - 2 * (x * x + z * z), 2 * (y * z - w * x)], axis=-1),
        jnp.stack([2 * (x * z - w * y), 2 * (y * z + w * x), 1 - 2 * (x * x + y * y)], axis=-1),
    ], axis=-2)


def _reference(pred_x, pred_q, target_x, target_q, c_R_w, w_P):
    q = pred_q / jnp.maximum(jnp.linalg.norm(pred_q, axis=1, keepdims=True), 1e-12)
    q = q * jnp.array([1.0, -1.0, -1.0, -1.0], jnp.float32)
    R = _quat_to_rotmat(q)
    tx = target_x.reshape(-1, 3)
    loss_x = jnp.mean(jnp.linalg.norm(pred_x - tx, axis=1))
    loss_q = jnp.mean(jnp.linalg.norm(q - target_q, axis=1))
    wpT = jnp.transpose(w_P, (0, 2, 1))                                  # (B,3,N)
    t_cp = jnp.einsum('bij,bjn->bin', c_R_w, wpT - target_x)
    p_cp = jnp.einsum('bij,bjn->bin', R, wpT - pred_x[:, :, None])
    t2d = t_cp[:, :2] / t_cp[:, 2:3]
    p2d = p_cp[:, :2] / p_cp[:, 2:3]
    l1 = jnp.sum(jnp.abs(p2d - t2d), axis=1)                             # (B,N)
    se = jnp.mean(l1, axis=1)
    se = jnp.where(jnp.isnan(se), 0.0, se)
    return jnp.mean(se), loss_x, loss_q


# ----------------------------------------------------------------------------
# Test-input builder (camera near origin, points in front, near-identity rot)
# ----------------------------------------------------------------------------
def _make_inputs(key, B, N):
    ks = jax.random.split(key, 8)
    pred_x = 0.1 * jax.random.normal(ks[0], (B, 3), jnp.float32)
    target_x = 0.1 * jax.random.normal(ks[1], (B, 3, 1), jnp.float32)
    pred_q = jnp.array([[1.0, 0.0, 0.0, 0.0]], jnp.float32) + \
        0.1 * jax.random.normal(ks[2], (B, 4), jnp.float32)
    target_q = jnp.array([[1.0, 0.0, 0.0, 0.0]], jnp.float32) + \
        0.1 * jax.random.normal(ks[3], (B, 4), jnp.float32)
    target_q = target_q / jnp.linalg.norm(target_q, axis=1, keepdims=True)
    cq = jnp.array([[1.0, 0.0, 0.0, 0.0]], jnp.float32) + \
        0.1 * jax.random.normal(ks[4], (B, 4), jnp.float32)
    cq = cq / jnp.linalg.norm(cq, axis=1, keepdims=True)
    c_R_w = _quat_to_rotmat(cq)                                          # (B,3,3)
    # World points emitted directly in the kernel's (3, B, N) layout.
    w_xy = jax.random.uniform(ks[6], (2, B, N), jnp.float32, minval=-1.0, maxval=1.0)
    w_z = jax.random.uniform(ks[7], (1, B, N), jnp.float32, minval=4.0, maxval=6.0)
    w_P_t = jnp.concatenate([w_xy, w_z], axis=0)                         # (3,B,N)
    return pred_x, pred_q, target_x, target_q, c_R_w, w_P_t


# ----------------------------------------------------------------------------
# Main
# ----------------------------------------------------------------------------
if __name__ == "__main__":
    key = jax.random.PRNGKey(0)
    k1, k2 = jax.random.split(key)
    loss_fn = jax.jit(geometric_loss)

    # Small shape consistent with the module (single-tile path).
    # Larger shape exercising the multi-B-tile / multi-N-tile pipelined path.
    for k, (B, N) in ((k1, (2, 8)), (k2, (24, 8192))):
        pred_x, pred_q, target_x, target_q, c_R_w, w_P_t = _make_inputs(k, B, N)
        batch_error, loss_x, loss_q = loss_fn(
            pred_x, pred_q, target_x, target_q, c_R_w, w_P_t)
        jax.block_until_ready((batch_error, loss_x, loss_q))

        w_P_bn3 = jnp.transpose(w_P_t, (1, 2, 0))   # reference-only layout
        ref = _reference(pred_x, pred_q, target_x, target_q, c_R_w, w_P_bn3)
        np.testing.assert_allclose(
            np.array([batch_error, loss_x, loss_q], dtype=np.float32),
            np.array(ref, dtype=np.float32), rtol=1e-3, atol=1e-4)

    print("KERNEL_OK")
</pallas_src>

<mosaic_0001>
module attributes {stable_mosaic.version = 11 : i64} {
  func.func @_geometric_loss_kernel(%arg0: i32, %arg1: i32, %arg2: memref<2x3xf32, #tpu.memory_space<vmem>>, %arg3: memref<2x4xf32, #tpu.memory_space<vmem>>, %arg4: memref<2x3xf32, #tpu.memory_space<vmem>>, %arg5: memref<2x4xf32, #tpu.memory_space<vmem>>, %arg6: memref<2x9xf32, #tpu.memory_space<vmem>>, %arg7: memref<3x2x8xf32, #tpu.memory_space<vmem>>, %arg8: memref<1x8x128xf32, #tpu.memory_space<vmem>>, %arg9: memref<24x2x1xf32, #tpu.memory_space<vmem>>, %arg10: memref<2x1xf32, #tpu.memory_space<vmem>>) attributes {dimension_semantics = [#tpu.dimension_semantics<parallel>, #tpu.dimension_semantics<arbitrary>], iteration_bounds = array<i64: 1, 1>, scalar_prefetch = 0 : i64, scratch_operands = 2 : i64, tpu.core_type = #tpu.core_type<tc>, window_params = [{transform_indices = @transform_0, window_bounds = array<i64: 2, 3>}, {transform_indices = @transform_1, window_bounds = array<i64: 2, 4>}, {transform_indices = @transform_2, window_bounds = array<i64: 2, 3>}, {transform_indices = @transform_3, window_bounds = array<i64: 2, 4>}, {transform_indices = @transform_4, window_bounds = array<i64: 2, 9>}, {transform_indices = @transform_5, window_bounds = array<i64: 3, 2, 8>}, {transform_indices = @transform_6, window_bounds = array<i64: 1, 8, 128>}]} {
    %c0_i32 = arith.constant 0 : i32
    %0 = arith.cmpi eq, %arg1, %c0_i32 : i32
    %1 = arith.extui %0 : i1 to i32
    %c0_i32_0 = arith.constant 0 : i32
    %2 = arith.cmpi ne, %1, %c0_i32_0 : i32
    scf.if %2 {
      %c0_64 = arith.constant 0 : index
      %c0_65 = arith.constant 0 : index
      %136 = vector.load %arg3[%c0_64, %c0_65] : memref<2x4xf32, #tpu.memory_space<vmem>>, vector<2x4xf32>
      %137 = arith.mulf %136, %136 : vector<2x4xf32>
      %cst_66 = arith.constant dense<0.000000e+00> : vector<2xf32>
      %138 = vector.multi_reduction <add>, %137, %cst_66 [1] : vector<2x4xf32> to vector<2xf32>
      %139 = vector.shape_cast %138 : vector<2xf32> to vector<2x1xf32>
      %140 = math.sqrt %139 : vector<2x1xf32>
      %cst_67 = arith.constant 9.99999996E-13 : f32
      %141 = vector.broadcast %cst_67 : f32 to vector<2x1xf32>
      %142 = arith.maximumf %140, %141 : vector<2x1xf32>
      %143 = vector.broadcast %142 : vector<2x1xf32> to vector<2x4xf32>
      %144 = arith.divf %136, %143 : vector<2x4xf32>
      %145 = vector.extract_strided_slice %144 {offsets = [0, 0], sizes = [2, 1], strides = [1, 1]} : vector<2x4xf32> to vector<2x1xf32>
      %146 = vector.extract_strided_slice %144 {offsets = [0, 1], sizes = [2, 1], strides = [1, 1]} : vector<2x4xf32> to vector<2x1xf32>
      %cst_68 = arith.constant 0.000000e+00 : f32
      %147 = vector.broadcast %cst_68 : f32 to vector<2x1xf32>
      %148 = arith.subf %147, %146 : vector<2x1xf32>
      %149 = vector.extract_strided_slice %144 {offsets = [0, 2], sizes = [2, 1], strides = [1, 1]} : vector<2x4xf32> to vector<2x1xf32>
      %cst_69 = arith.constant 0.000000e+00 : f32
      %150 = vector.broadcast %cst_69 : f32 to vector<2x1xf32>
      %151 = arith.subf %150, %149 : vector<2x1xf32>
      %152 = vector.extract_strided_slice %144 {offsets = [0, 3], sizes = [2, 1], strides = [1, 1]} : vector<2x4xf32> to vector<2x1xf32>
      %cst_70 = arith.constant 0.000000e+00 : f32
      %153 = vector.broadcast %cst_70 : f32 to vector<2x1xf32>
      %154 = arith.subf %153, %152 : vector<2x1xf32>
      %155 = arith.mulf %151, %151 : vector<2x1xf32>
      %156 = arith.mulf %154, %154 : vector<2x1xf32>
      %157 = arith.addf %155, %156 : vector<2x1xf32>
      %cst_71 = arith.constant 2.000000e+00 : f32
      %158 = vector.broadcast %cst_71 : f32 to vector<2x1xf32>
      %159 = arith.mulf %158, %157 : vector<2x1xf32>
      %cst_72 = arith.constant 1.000000e+00 : f32
      %160 = vector.broadcast %cst_72 : f32 to vector<2x1xf32>
      %161 = arith.subf %160, %159 : vector<2x1xf32>
      %c0_73 = arith.constant 0 : index
      %c0_74 = arith.constant 0 : index
      %c0_75 = arith.constant 0 : index
      %162 = vector.load %arg9[%c0_73, %c0_74, %c0_75] : memref<24x2x1xf32, #tpu.memory_space<vmem>>, vector<1x2x1xf32>
      %163 = vector.shape_cast %162 : vector<1x2x1xf32> to vector<2x1xf32>
      %164 = vector.shape_cast %161 : vector<2x1xf32> to vector<1x2x1xf32>
      tpu.vector_store %arg9[%c0_73, %c0_74, %c0_75], %164 {strides = array<i32>} : memref<24x2x1xf32, #tpu.memory_space<vmem>>, vector<1x2x1xf32>,
      %165 = arith.mulf %148, %151 : vector<2x1xf32>
      %166 = arith.mulf %145, %154 : vector<2x1xf32>
      %167 = arith.subf %165, %166 : vector<2x1xf32>
      %cst_76 = arith.constant 2.000000e+00 : f32
      %168 = vector.broadcast %cst_76 : f32 to vector<2x1xf32>
      %169 = arith.mulf %168, %167 : vector<2x1xf32>
      %c1_77 = arith.constant 1 : index
      %c0_78 = arith.constant 0 : index
      %c0_79 = arith.constant 0 : index
      %170 = vector.load %arg9[%c1_77, %c0_78, %c0_79] : memref<24x2x1xf32, #tpu.memory_space<vmem>>, vector<1x2x1xf32>
      %171 = vector.shape_cast %170 : vector<1x2x1xf32> to vector<2x1xf32>
      %172 = vector.shape_cast %169 : vector<2x1xf32> to vector<1x2x1xf32>
      tpu.vector_store %arg9[%c1_77, %c0_78, %c0_79], %172 {strides = array<i32>} : memref<24x2x1xf32, #tpu.memory_space<vmem>>, vector<1x2x1xf32>,
      %173 = arith.mulf %148, %154 : vector<2x1xf32>
      %174 = arith.mulf %145, %151 : vector<2x1xf32>
      %175 = arith.addf %173, %174 : vector<2x1xf32>
      %cst_80 = arith.constant 2.000000e+00 : f32
      %176 = vector.broadcast %cst_80 : f32 to vector<2x1xf32>
      %177 = arith.mulf %176, %175 : vector<2x1xf32>
      %c2_81 = arith.constant 2 : index
      %c0_82 = arith.constant 0 : index
      %c0_83 = arith.constant 0 : index
      %178 = vector.load %arg9[%c2_81, %c0_82, %c0_83] : memref<24x2x1xf32, #tpu.memory_space<vmem>>, vector<1x2x1xf32>
      %179 = vector.shape_cast %178 : vector<1x2x1xf32> to vector<2x1xf32>
      %180 = vector.shape_cast %177 : vector<2x1xf32> to vector<1x2x1xf32>
      tpu.vector_store %arg9[%c2_81, %c0_82, %c0_83], %180 {strides = array<i32>} : memref<24x2x1xf32, #tpu.memory_space<vmem>>, vector<1x2x1xf32>,
      %181 = arith.mulf %148, %151 : vector<2x1xf32>
      %182 = arith.mulf %145, %154 : vector<2x1xf32>
      %183 = arith.addf %181, %182 : vector<2x1xf32>
      %cst_84 = arith.constant 2.000000e+00 : f32
      %184 = vector.broadcast %cst_84 : f32 to vector<2x1xf32>
      %185 = arith.mulf %184, %183 : vector<2x1xf32>
      %c3_85 = arith.constant 3 : index
      %c0_86 = arith.constant 0 : index
      %c0_87 = arith.constant 0 : index
      %186 = vector.load %arg9[%c3_85, %c0_86, %c0_87] : memref<24x2x1xf32, #tpu.memory_space<vmem>>, vector<1x2x1xf32>
      %187 = vector.shape_cast %186 : vector<1x2x1xf32> to vector<2x1xf32>
      %188 = vector.shape_cast %185 : vector<2x1xf32> to vector<1x2x1xf32>
      tpu.vector_store %arg9[%c3_85, %c0_86, %c0_87], %188 {strides = array<i32>} : memref<24x2x1xf32, #tpu.memory_space<vmem>>, vector<1x2x1xf32>,
      %189 = arith.mulf %148, %148 : vector<2x1xf32>
      %190 = arith.mulf %154, %154 : vector<2x1xf32>
      %191 = arith.addf %189, %190 : vector<2x1xf32>
      %cst_88 = arith.constant 2.000000e+00 : f32
      %192 = vector.broadcast %cst_88 : f32 to vector<2x1xf32>
      %193 = arith.mulf %192, %191 : vector<2x1xf32>
      %cst_89 = arith.constant 1.000000e+00 : f32
      %194 = vector.broadcast %cst_89 : f32 to vector<2x1xf32>
      %195 = arith.subf %194, %193 : vector<2x1xf32>
      %c4_90 = arith.constant 4 : index
      %c0_91 = arith.constant 0 : index
      %c0_92 = arith.constant 0 : index
      %196 = vector.load %arg9[%c4_90, %c0_91, %c0_92] : memref<24x2x1xf32, #tpu.memory_space<vmem>>, vector<1x2x1xf32>
      %197 = vector.shape_cast %196 : vector<1x2x1xf32> to vector<2x1xf32>
      %198 = vector.shape_cast %195 : vector<2x1xf32> to vector<1x2x1xf32>
      tpu.vector_store %arg9[%c4_90, %c0_91, %c0_92], %198 {strides = array<i32>} : memref<24x2x1xf32, #tpu.memory_space<vmem>>, vector<1x2x1xf32>,
      %199 = arith.mulf %151, %154 : vector<2x1xf32>
      %200 = arith.mulf %145, %148 : vector<2x1xf32>
      %201 = arith.subf %199, %200 : vector<2x1xf32>
      %cst_93 = arith.constant 2.000000e+00 : f32
      %202 = vector.broadcast %cst_93 : f32 to vector<2x1xf32>
      %203 = arith.mulf %202, %201 : vector<2x1xf32>
      %c5_94 = arith.constant 5 : index
      %c0_95 = arith.constant 0 : index
      %c0_96 = arith.constant 0 : index
      %204 = vector.load %arg9[%c5_94, %c0_95, %c0_96] : memref<24x2x1xf32, #tpu.memory_space<vmem>>, vector<1x2x1xf32>
      %205 = vector.shape_cast %204 : vector<1x2x1xf32> to vector<2x1xf32>
      %206 = vector.shape_cast %203 : vector<2x1xf32> to vector<1x2x1xf32>
      tpu.vector_store %arg9[%c5_94, %c0_95, %c0_96], %206 {strides = array<i32>} : memref<24x2x1xf32, #tpu.memory_space<vmem>>, vector<1x2x1xf32>,
      %207 = arith.mulf %148, %154 : vector<2x1xf32>
      %208 = arith.mulf %145, %151 : vector<2x1xf32>
      %209 = arith.subf %207, %208 : vector<2x1xf32>
      %cst_97 = arith.constant 2.000000e+00 : f32
      %210 = vector.broadcast %cst_97 : f32 to vector<2x1xf32>
      %211 = arith.mulf %210, %209 : vector<2x1xf32>
      %c6_98 = arith.constant 6 : index
      %c0_99 = arith.constant 0 : index
      %c0_100 = arith.constant 0 : index
      %212 = vector.load %arg9[%c6_98, %c0_99, %c0_100] : memref<24x2x1xf32, #tpu.memory_space<vmem>>, vector<1x2x1xf32>
      %213 = vector.shape_cast %212 : vector<1x2x1xf32> to vector<2x1xf32>
      %214 = vector.shape_cast %211 : vector<2x1xf32> to vector<1x2x1xf32>
      tpu.vector_store %arg9[%c6_98, %c0_99, %c0_100], %214 {strides = array<i32>} : memref<24x2x1xf32, #tpu.memory_space<vmem>>, vector<1x2x1xf32>,
      %215 = arith.mulf %151, %154 : vector<2x1xf32>
      %216 = arith.mulf %145, %148 : vector<2x1xf32>
      %217 = arith.addf %215, %216 : vector<2x1xf32>
      %cst_101 = arith.constant 2.000000e+00 : f32
      %218 = vector.broadcast %cst_101 : f32 to vector<2x1xf32>
      %219 = arith.mulf %218, %217 : vector<2x1xf32>
      %c7_102 = arith.constant 7 : index
      %c0_103 = arith.constant 0 : index
      %c0_104 = arith.constant 0 : index
      %220 = vector.load %arg9[%c7_102, %c0_103, %c0_104] : memref<24x2x1xf32, #tpu.memory_space<vmem>>, vector<1x2x1xf32>
      %221 = vector.shape_cast %220 : vector<1x2x1xf32> to vector<2x1xf32>
      %222 = vector.shape_cast %219 : vector<2x1xf32> to vector<1x2x1xf32>
      tpu.vector_store %arg9[%c7_102, %c0_103, %c0_104], %222 {strides = array<i32>} : memref<24x2x1xf32, #tpu.memory_space<vmem>>, vector<1x2x1xf32>,
      %223 = arith.mulf %148, %148 : vector<2x1xf32>
      %224 = arith.mulf %151, %151 : vector<2x1xf32>
      %225 = arith.addf %223, %224 : vector<2x1xf32>
      %cst_105 = arith.constant 2.000000e+00 : f32
      %226 = vector.broadcast %cst_105 : f32 to vector<2x1xf32>
      %227 = arith.mulf %226, %225 : vector<2x1xf32>
      %cst_106 = arith.constant 1.000000e+00 : f32
      %228 = vector.broadcast %cst_106 : f32 to vector<2x1xf32>
      %229 = arith.subf %228, %227 : vector<2x1xf32>
      %c8_107 = arith.constant 8 : index
      %c0_108 = arith.constant 0 : index
      %c0_109 = arith.constant 0 : index
      %230 = vector.load %arg9[%c8_107, %c0_108, %c0_109] : memref<24x2x1xf32, #tpu.memory_space<vmem>>, vector<1x2x1xf32>
      %231 = vector.shape_cast %230 : vector<1x2x1xf32> to vector<2x1xf32>
      %232 = vector.shape_cast %229 : vector<2x1xf32> to vector<1x2x1xf32>
      tpu.vector_store %arg9[%c8_107, %c0_108, %c0_109], %232 {strides = array<i32>} : memref<24x2x1xf32, #tpu.memory_space<vmem>>, vector<1x2x1xf32>,
      %c0_110 = arith.constant 0 : index
      %c0_111 = arith.constant 0 : index
      %233 = vector.load %arg6[%c0_110, %c0_111] : memref<2x9xf32, #tpu.memory_space<vmem>>, vector<2x9xf32>
      %234 = vector.extract_strided_slice %233 {offsets = [0, 0], sizes = [2, 1], strides = [1, 1]} : vector<2x9xf32> to vector<2x1xf32>
      %c9_112 = arith.constant 9 : index
      %c0_113 = arith.constant 0 : index
      %c0_114 = arith.constant 0 : index
      %235 = vector.load %arg9[%c9_112, %c0_113, %c0_114] : memref<24x2x1xf32, #tpu.memory_space<vmem>>, vector<1x2x1xf32>
      %236 = vector.shape_cast %235 : vector<1x2x1xf32> to vector<2x1xf32>
      %237 = vector.shape_cast %234 : vector<2x1xf32> to vector<1x2x1xf32>
      tpu.vector_store %arg9[%c9_112, %c0_113, %c0_114], %237 {strides = array<i32>} : memref<24x2x1xf32, #tpu.memory_space<vmem>>, vector<1x2x1xf32>,
      %238 = vector.extract_strided_slice %233 {offsets = [0, 1], sizes = [2, 1], strides = [1, 1]} : vector<2x9xf32> to vector<2x1xf32>
      %c10_115 = arith.constant 10 : index
      %c0_116 = arith.constant 0 : index
      %c0_117 = arith.constant 0 : index
      %239 = vector.load %arg9[%c10_115, %c0_116, %c0_117] : memref<24x2x1xf32, #tpu.memory_space<vmem>>, vector<1x2x1xf32>
      %240 = vector.shape_cast %239 : vector<1x2x1xf32> to vector<2x1xf32>
      %241 = vector.shape_cast %238 : vector<2x1xf32> to vector<1x2x1xf32>
      tpu.vector_store %arg9[%c10_115, %c0_116, %c0_117], %241 {strides = array<i32>} : memref<24x2x1xf32, #tpu.memory_space<vmem>>, vector<1x2x1xf32>,
      %242 = vector.extract_strided_slice %233 {offsets = [0, 2], sizes = [2, 1], strides = [1, 1]} : vector<2x9xf32> to vector<2x1xf32>
      %c11_118 = arith.constant 11 : index
      %c0_119 = arith.constant 0 : index
      %c0_120 = arith.constant 0 : index
      %243 = vector.load %arg9[%c11_118, %c0_119, %c0_120] : memref<24x2x1xf32, #tpu.memory_space<vmem>>, vector<1x2x1xf32>
      %244 = vector.shape_cast %243 : vector<1x2x1xf32> to vector<2x1xf32>
      %245 = vector.shape_cast %242 : vector<2x1xf32> to vector<1x2x1xf32>
      tpu.vector_store %arg9[%c11_118, %c0_119, %c0_120], %245 {strides = array<i32>} : memref<24x2x1xf32, #tpu.memory_space<vmem>>, vector<1x2x1xf32>,
      %246 = vector.extract_strided_slice %233 {offsets = [0, 3], sizes = [2, 1], strides = [1, 1]} : vector<2x9xf32> to vector<2x1xf32>
      %c12_121 = arith.constant 12 : index
      %c0_122 = arith.constant 0 : index
      %c0_123 = arith.constant 0 : index
      %247 = vector.load %arg9[%c12_121, %c0_122, %c0_123] : memref<24x2x1xf32, #tpu.memory_space<vmem>>, vector<1x2x1xf32>
      %248 = vector.shape_cast %247 : vector<1x2x1xf32> to vector<2x1xf32>
      %249 = vector.shape_cast %246 : vector<2x1xf32> to vector<1x2x1xf32>
      tpu.vector_store %arg9[%c12_121, %c0_122, %c0_123], %249 {strides = array<i32>} : memref<24x2x1xf32, #tpu.memory_space<vmem>>, vector<1x2x1xf32>,
      %250 = vector.extract_strided_slice %233 {offsets = [0, 4], sizes = [2, 1], strides = [1, 1]} : vector<2x9xf32> to vector<2x1xf32>
      %c13_124 = arith.constant 13 : index
      %c0_125 = arith.constant 0 : index
      %c0_126 = arith.constant 0 : index
      %251 = vector.load %arg9[%c13_124, %c0_125, %c0_126] : memref<24x2x1xf32, #tpu.memory_space<vmem>>, vector<1x2x1xf32>
      %252 = vector.shape_cast %251 : vector<1x2x1xf32> to vector<2x1xf32>
      %253 = vector.shape_cast %250 : vector<2x1xf32> to vector<1x2x1xf32>
      tpu.vector_store %arg9[%c13_124, %c0_125, %c0_126], %253 {strides = array<i32>} : memref<24x2x1xf32, #tpu.memory_space<vmem>>, vector<1x2x1xf32>,
      %254 = vector.extract_strided_slice %233 {offsets = [0, 5], sizes = [2, 1], strides = [1, 1]} : vector<2x9xf32> to vector<2x1xf32>
      %c14_127 = arith.constant 14 : index
      %c0_128 = arith.constant 0 : index
      %c0_129 = arith.constant 0 : index
      %255 = vector.load %arg9[%c14_127, %c0_128, %c0_129] : memref<24x2x1xf32, #tpu.memory_space<vmem>>, vector<1x2x1xf32>
      %256 = vector.shape_cast %255 : vector<1x2x1xf32> to vector<2x1xf32>
      %257 = vector.shape_cast %254 : vector<2x1xf32> to vector<1x2x1xf32>
      tpu.vector_store %arg9[%c14_127, %c0_128, %c0_129], %257 {strides = array<i32>} : memref<24x2x1xf32, #tpu.memory_space<vmem>>, vector<1x2x1xf32>,
      %258 = vector.extract_strided_slice %233 {offsets = [0, 6], sizes = [2, 1], strides = [1, 1]} : vector<2x9xf32> to vector<2x1xf32>
      %c15_130 = arith.constant 15 : index
      %c0_131 = arith.constant 0 : index
      %c0_132 = arith.constant 0 : index
      %259 = vector.load %arg9[%c15_130, %c0_131, %c0_132] : memref<24x2x1xf32, #tpu.memory_space<vmem>>, vector<1x2x1xf32>
      %260 = vector.shape_cast %259 : vector<1x2x1xf32> to vector<2x1xf32>
      %261 = vector.shape_cast %258 : vector<2x1xf32> to vector<1x2x1xf32>
      tpu.vector_store %arg9[%c15_130, %c0_131, %c0_132], %261 {strides = array<i32>} : memref<24x2x1xf32, #tpu.memory_space<vmem>>, vector<1x2x1xf32>,
      %262 = vector.extract_strided_slice %233 {offsets = [0, 7], sizes = [2, 1], strides = [1, 1]} : vector<2x9xf32> to vector<2x1xf32>
      %c16_133 = arith.constant 16 : index
      %c0_134 = arith.constant 0 : index
      %c0_135 = arith.constant 0 : index
      %263 = vector.load %arg9[%c16_133, %c0_134, %c0_135] : memref<24x2x1xf32, #tpu.memory_space<vmem>>, vector<1x2x1xf32>
      %264 = vector.shape_cast %263 : vector<1x2x1xf32> to vector<2x1xf32>
      %265 = vector.shape_cast %262 : vector<2x1xf32> to vector<1x2x1xf32>
      tpu.vector_store %arg9[%c16_133, %c0_134, %c0_135], %265 {strides = array<i32>} : memref<24x2x1xf32, #tpu.memory_space<vmem>>, vector<1x2x1xf32>,
      %266 = vector.extract_strided_slice %233 {offsets = [0, 8], sizes = [2, 1], strides = [1, 1]} : vector<2x9xf32> to vector<2x1xf32>
      %c17_136 = arith.constant 17 : index
      %c0_137 = arith.constant 0 : index
      %c0_138 = arith.constant 0 : index
      %267 = vector.load %arg9[%c17_136, %c0_137, %c0_138] : memref<24x2x1xf32, #tpu.memory_space<vmem>>, vector<1x2x1xf32>
      %268 = vector.shape_cast %267 : vector<1x2x1xf32> to vector<2x1xf32>
      %269 = vector.shape_cast %266 : vector<2x1xf32> to vector<1x2x1xf32>
      tpu.vector_store %arg9[%c17_136, %c0_137, %c0_138], %269 {strides = array<i32>} : memref<24x2x1xf32, #tpu.memory_space<vmem>>, vector<1x2x1xf32>,
      %c0_139 = arith.constant 0 : index
      %c0_140 = arith.constant 0 : index
      %270 = vector.load %arg2[%c0_139, %c0_140] : memref<2x3xf32, #tpu.memory_space<vmem>>, vector<2x3xf32>
      %c0_141 = arith.constant 0 : index
      %c0_142 = arith.constant 0 : index
      %271 = vector.load %arg4[%c0_141, %c0_142] : memref<2x3xf32, #tpu.memory_space<vmem>>, vector<2x3xf32>
      %272 = vector.extract_strided_slice %270 {offsets = [0, 0], sizes = [2, 1], strides = [1, 1]} : vector<2x3xf32> to vector<2x1xf32>
      %c18_143 = arith.constant 18 : index
      %c0_144 = arith.constant 0 : index
      %c0_145 = arith.constant 0 : index
      %273 = vector.load %arg9[%c18_143, %c0_144, %c0_145] : memref<24x2x1xf32, #tpu.memory_space<vmem>>, vector<1x2x1xf32>
      %274 = vector.shape_cast %273 : vector<1x2x1xf32> to vector<2x1xf32>
      %275 = vector.shape_cast %272 : vector<2x1xf32> to vector<1x2x1xf32>
      tpu.vector_store %arg9[%c18_143, %c0_144, %c0_145], %275 {strides = array<i32>} : memref<24x2x1xf32, #tpu.memory_space<vmem>>, vector<1x2x1xf32>,
      %276 = vector.extract_strided_slice %271 {offsets = [0, 0], sizes = [2, 1], strides = [1, 1]} : vector<2x3xf32> to vector<2x1xf32>
      %c21_146 = arith.constant 21 : index
      %c0_147 = arith.constant 0 : index
      %c0_148 = arith.constant 0 : index
      %277 = vector.load %arg9[%c21_146, %c0_147, %c0_148] : memref<24x2x1xf32, #tpu.memory_space<vmem>>, vector<1x2x1xf32>
      %278 = vector.shape_cast %277 : vector<1x2x1xf32> to vector<2x1xf32>
      %279 = vector.shape_cast %276 : vector<2x1xf32> to vector<1x2x1xf32>
      tpu.vector_store %arg9[%c21_146, %c0_147, %c0_148], %279 {strides = array<i32>} : memref<24x2x1xf32, #tpu.memory_space<vmem>>, vector<1x2x1xf32>,
      %280 = vector.extract_strided_slice %270 {offsets = [0, 1], sizes = [2, 1], strides = [1, 1]} : vector<2x3xf32> to vector<2x1xf32>
      %c19_149 = arith.constant 19 : index
      %c0_150 = arith.constant 0 : index
      %c0_151 = arith.constant 0 : index
      %281 = vector.load %arg9[%c19_149, %c0_150, %c0_151] : memref<24x2x1xf32, #tpu.memory_space<vmem>>, vector<1x2x1xf32>
      %282 = vector.shape_cast %281 : vector<1x2x1xf32> to vector<2x1xf32>
      %283 = vector.shape_cast %280 : vector<2x1xf32> to vector<1x2x1xf32>
      tpu.vector_store %arg9[%c19_149, %c0_150, %c0_151], %283 {strides = array<i32>} : memref<24x2x1xf32, #tpu.memory_space<vmem>>, vector<1x2x1xf32>,
      %284 = vector.extract_strided_slice %271 {offsets = [0, 1], sizes = [2, 1], strides = [1, 1]} : vector<2x3xf32> to vector<2x1xf32>
      %c22_152 = arith.constant 22 : index
      %c0_153 = arith.constant 0 : index
      %c0_154 = arith.constant 0 : index
      %285 = vector.load %arg9[%c22_152, %c0_153, %c0_154] : memref<24x2x1xf32, #tpu.memory_space<vmem>>, vector<1x2x1xf32>
      %286 = vector.shape_cast %285 : vector<1x2x1xf32> to vector<2x1xf32>
      %287 = vector.shape_cast %284 : vector<2x1xf32> to vector<1x2x1xf32>
      tpu.vector_store %arg9[%c22_152, %c0_153, %c0_154], %287 {strides = array<i32>} : memref<24x2x1xf32, #tpu.memory_space<vmem>>, vector<1x2x1xf32>,
      %288 = vector.extract_strided_slice %270 {offsets = [0, 2], sizes = [2, 1], strides = [1, 1]} : vector<2x3xf32> to vector<2x1xf32>
      %c20_155 = arith.constant 20 : index
      %c0_156 = arith.constant 0 : index
      %c0_157 = arith.constant 0 : index
      %289 = vector.load %arg9[%c20_155, %c0_156, %c0_157] : memref<24x2x1xf32, #tpu.memory_space<vmem>>, vector<1x2x1xf32>
      %290 = vector.shape_cast %289 : vector<1x2x1xf32> to vector<2x1xf32>
      %291 = vector.shape_cast %288 : vector<2x1xf32> to vector<1x2x1xf32>
      tpu.vector_store %arg9[%c20_155, %c0_156, %c0_157], %291 {strides = array<i32>} : memref<24x2x1xf32, #tpu.memory_space<vmem>>, vector<1x2x1xf32>,
      %292 = vector.extract_strided_slice %271 {offsets = [0, 2], sizes = [2, 1], strides = [1, 1]} : vector<2x3xf32> to vector<2x1xf32>
      %c23_158 = arith.constant 23 : index
      %c0_159 = arith.constant 0 : index
      %c0_160 = arith.constant 0 : index
      %293 = vector.load %arg9[%c23_158, %c0_159, %c0_160] : memref<24x2x1xf32, #tpu.memory_space<vmem>>, vector<1x2x1xf32>
      %294 = vector.shape_cast %293 : vector<1x2x1xf32> to vector<2x1xf32>
      %295 = vector.shape_cast %292 : vector<2x1xf32> to vector<1x2x1xf32>
      tpu.vector_store %arg9[%c23_158, %c0_159, %c0_160], %295 {strides = array<i32>} : memref<24x2x1xf32, #tpu.memory_space<vmem>>, vector<1x2x1xf32>,
      %cst_161 = arith.constant 0.000000e+00 : f32
      %296 = vector.broadcast %cst_161 : f32 to vector<2x1xf32>
      %c0_162 = arith.constant 0 : index
      %c0_163 = arith.constant 0 : index
      %297 = vector.load %arg10[%c0_162, %c0_163] : memref<2x1xf32, #tpu.memory_space<vmem>>, vector<2x1xf32>
      tpu.vector_store %arg10[%c0_162, %c0_163], %296 {strides = array<i32>} : memref<2x1xf32, #tpu.memory_space<vmem>>, vector<2x1xf32>,
    } else {
    }
    %c0 = arith.constant 0 : index
    %c0_1 = arith.constant 0 : index
    %c0_2 = arith.constant 0 : index
    %3 = vector.load %arg7[%c0, %c0_1, %c0_2] : memref<3x2x8xf32, #tpu.memory_space<vmem>>, vector<1x2x8xf32>
    %4 = vector.shape_cast %3 : vector<1x2x8xf32> to vector<2x8xf32>
    %c1 = arith.constant 1 : index
    %c0_3 = arith.constant 0 : index
    %c0_4 = arith.constant 0 : index
    %5 = vector.load %arg7[%c1, %c0_3, %c0_4] : memref<3x2x8xf32, #tpu.memory_space<vmem>>, vector<1x2x8xf32>
    %6 = vector.shape_cast %5 : vector<1x2x8xf32> to vector<2x8xf32>
    %c2 = arith.constant 2 : index
    %c0_5 = arith.constant 0 : index
    %c0_6 = arith.constant 0 : index
    %7 = vector.load %arg7[%c2, %c0_5, %c0_6] : memref<3x2x8xf32, #tpu.memory_space<vmem>>, vector<1x2x8xf32>
    %8 = vector.shape_cast %7 : vector<1x2x8xf32> to vector<2x8xf32>
    %c0_7 = arith.constant 0 : index
    %c0_8 = arith.constant 0 : index
    %c0_9 = arith.constant 0 : index
    %9 = vector.load %arg9[%c0_7, %c0_8, %c0_9] : memref<24x2x1xf32, #tpu.memory_space<vmem>>, vector<1x2x1xf32>
    %10 = vector.shape_cast %9 : vector<1x2x1xf32> to vector<2x1xf32>
    %c1_10 = arith.constant 1 : index
    %c0_11 = arith.constant 0 : index
    %c0_12 = arith.constant 0 : index
    %11 = vector.load %arg9[%c1_10, %c0_11, %c0_12] : memref<24x2x1xf32, #tpu.memory_space<vmem>>, vector<1x2x1xf32>
    %12 = vector.shape_cast %11 : vector<1x2x1xf32> to vector<2x1xf32>
    %c2_13 = arith.constant 2 : index
    %c0_14 = arith.constant 0 : index
    %c0_15 = arith.constant 0 : index
    %13 = vector.load %arg9[%c2_13, %c0_14, %c0_15] : memref<24x2x1xf32, #tpu.memory_space<vmem>>, vector<1x2x1xf32>
    %14 = vector.shape_cast %13 : vector<1x2x1xf32> to vector<2x1xf32>
    %c3 = arith.constant 3 : index
    %c0_16 = arith.constant 0 : index
    %c0_17 = arith.constant 0 : index
    %15 = vector.load %arg9[%c3, %c0_16, %c0_17] : memref<24x2x1xf32, #tpu.memory_space<vmem>>, vector<1x2x1xf32>
    %16 = vector.shape_cast %15 : vector<1x2x1xf32> to vector<2x1xf32>
    %c4 = arith.constant 4 : index
    %c0_18 = arith.constant 0 : index
    %c0_19 = arith.constant 0 : index
    %17 = vector.load %arg9[%c4, %c0_18, %c0_19] : memref<24x2x1xf32, #tpu.memory_space<vmem>>, vector<1x2x1xf32>
    %18 = vector.shape_cast %17 : vector<1x2x1xf32> to vector<2x1xf32>
    %c5 = arith.constant 5 : index
    %c0_20 = arith.constant 0 : index
    %c0_21 = arith.constant 0 : index
    %19 = vector.load %arg9[%c5, %c0_20, %c0_21] : memref<24x2x1xf32, #tpu.memory_space<vmem>>, vector<1x2x1xf32>
    %20 = vector.shape_cast %19 : vector<1x2x1xf32> to vector<2x1xf32>
    %c6 = arith.constant 6 : index
    %c0_22 = arith.constant 0 : index
    %c0_23 = arith.constant 0 : index
    %21 = vector.load %arg9[%c6, %c0_22, %c0_23] : memref<24x2x1xf32, #tpu.memory_space<vmem>>, vector<1x2x1xf32>
    %22 = vector.shape_cast %21 : vector<1x2x1xf32> to vector<2x1xf32>
    %c7 = arith.constant 7 : index
    %c0_24 = arith.constant 0 : index
    %c0_25 = arith.constant 0 : index
    %23 = vector.load %arg9[%c7, %c0_24, %c0_25] : memref<24x2x1xf32, #tpu.memory_space<vmem>>, vector<1x2x1xf32>
    %24 = vector.shape_cast %23 : vector<1x2x1xf32> to vector<2x1xf32>
    %c8 = arith.constant 8 : index
    %c0_26 = arith.constant 0 : index
    %c0_27 = arith.constant 0 : index
    %25 = vector.load %arg9[%c8, %c0_26, %c0_27] : memref<24x2x1xf32, #tpu.memory_space<vmem>>, vector<1x2x1xf32>
    %26 = vector.shape_cast %25 : vector<1x2x1xf32> to vector<2x1xf32>
    %c9 = arith.constant 9 : index
    %c0_28 = arith.constant 0 : index
    %c0_29 = arith.constant 0 : index
    %27 = vector.load %arg9[%c9, %c0_28, %c0_29] : memref<24x2x1xf32, #tpu.memory_space<vmem>>, vector<1x2x1xf32>
    %28 = vector.shape_cast %27 : vector<1x2x1xf32> to vector<2x1xf32>
    %c10 = arith.constant 10 : index
    %c0_30 = arith.constant 0 : index
    %c0_31 = arith.constant 0 : index
    %29 = vector.load %arg9[%c10, %c0_30, %c0_31] : memref<24x2x1xf32, #tpu.memory_space<vmem>>, vector<1x2x1xf32>
    %30 = vector.shape_cast %29 : vector<1x2x1xf32> to vector<2x1xf32>
    %c11 = arith.constant 11 : index
    %c0_32 = arith.constant 0 : index
    %c0_33 = arith.constant 0 : index
    %31 = vector.load %arg9[%c11, %c0_32, %c0_33] : memref<24x2x1xf32, #tpu.memory_space<vmem>>, vector<1x2x1xf32>
    %32 = vector.shape_cast %31 : vector<1x2x1xf32> to vector<2x1xf32>
    %c12 = arith.constant 12 : index
    %c0_34 = arith.constant 0 : index
    %c0_35 = arith.constant 0 : index
    %33 = vector.load %arg9[%c12, %c0_34, %c0_35] : memref<24x2x1xf32, #tpu.memory_space<vmem>>, vector<1x2x1xf32>
    %34 = vector.shape_cast %33 : vector<1x2x1xf32> to vector<2x1xf32>
    %c13 = arith.constant 13 : index
    %c0_36 = arith.constant 0 : index
    %c0_37 = arith.constant 0 : index
    %35 = vector.load %arg9[%c13, %c0_36, %c0_37] : memref<24x2x1xf32, #tpu.memory_space<vmem>>, vector<1x2x1xf32>
    %36 = vector.shape_cast %35 : vector<1x2x1xf32> to vector<2x1xf32>
    %c14 = arith.constant 14 : index
    %c0_38 = arith.constant 0 : index
    %c0_39 = arith.constant 0 : index
    %37 = vector.load %arg9[%c14, %c0_38, %c0_39] : memref<24x2x1xf32, #tpu.memory_space<vmem>>, vector<1x2x1xf32>
    %38 = vector.shape_cast %37 : vector<1x2x1xf32> to vector<2x1xf32>
    %c15 = arith.constant 15 : index
    %c0_40 = arith.constant 0 : index
    %c0_41 = arith.constant 0 : index
    %39 = vector.load %arg9[%c15, %c0_40, %c0_41] : memref<24x2x1xf32, #tpu.memory_space<vmem>>, vector<1x2x1xf32>
    %40 = vector.shape_cast %39 : vector<1x2x1xf32> to vector<2x1xf32>
    %c16 = arith.constant 16 : index
    %c0_42 = arith.constant 0 : index
    %c0_43 = arith.constant 0 : index
    %41 = vector.load %arg9[%c16, %c0_42, %c0_43] : memref<24x2x1xf32, #tpu.memory_space<vmem>>, vector<1x2x1xf32>
    %42 = vector.shape_cast %41 : vector<1x2x1xf32> to vector<2x1xf32>
    %c17 = arith.constant 17 : index
    %c0_44 = arith.constant 0 : index
    %c0_45 = arith.constant 0 : index
    %43 = vector.load %arg9[%c17, %c0_44, %c0_45] : memref<24x2x1xf32, #tpu.memory_space<vmem>>, vector<1x2x1xf32>
    %44 = vector.shape_cast %43 : vector<1x2x1xf32> to vector<2x1xf32>
    %c18 = arith.constant 18 : index
    %c0_46 = arith.constant 0 : index
    %c0_47 = arith.constant 0 : index
    %45 = vector.load %arg9[%c18, %c0_46, %c0_47] : memref<24x2x1xf32, #tpu.memory_space<vmem>>, vector<1x2x1xf32>
    %46 = vector.shape_cast %45 : vector<1x2x1xf32> to vector<2x1xf32>
    %c19 = arith.constant 19 : index
    %c0_48 = arith.constant 0 : index
    %c0_49 = arith.constant 0 : index
    %47 = vector.load %arg9[%c19, %c0_48, %c0_49] : memref<24x2x1xf32, #tpu.memory_space<vmem>>, vector<1x2x1xf32>
    %48 = vector.shape_cast %47 : vector<1x2x1xf32> to vector<2x1xf32>
    %c20 = arith.constant 20 : index
    %c0_50 = arith.constant 0 : index
    %c0_51 = arith.constant 0 : index
    %49 = vector.load %arg9[%c20, %c0_50, %c0_51] : memref<24x2x1xf32, #tpu.memory_space<vmem>>, vector<1x2x1xf32>
    %50 = vector.shape_cast %49 : vector<1x2x1xf32> to vector<2x1xf32>
    %c21 = arith.constant 21 : index
    %c0_52 = arith.constant 0 : index
    %c0_53 = arith.constant 0 : index
    %51 = vector.load %arg9[%c21, %c0_52, %c0_53] : memref<24x2x1xf32, #tpu.memory_space<vmem>>, vector<1x2x1xf32>
    %52 = vector.shape_cast %51 : vector<1x2x1xf32> to vector<2x1xf32>
    %c22 = arith.constant 22 : index
    %c0_54 = arith.constant 0 : index
    %c0_55 = arith.constant 0 : index
    %53 = vector.load %arg9[%c22, %c0_54, %c0_55] : memref<24x2x1xf32, #tpu.memory_space<vmem>>, vector<1x2x1xf32>
    %54 = vector.shape_cast %53 : vector<1x2x1xf32> to vector<2x1xf32>
    %c23 = arith.constant 23 : index
    %c0_56 = arith.constant 0 : index
    %c0_57 = arith.constant 0 : index
    %55 = vector.load %arg9[%c23, %c0_56, %c0_57] : memref<24x2x1xf32, #tpu.memory_space<vmem>>, vector<1x2x1xf32>
    %56 = vector.shape_cast %55 : vector<1x2x1xf32> to vector<2x1xf32>
    %57 = vector.broadcast %46 : vector<2x1xf32> to vector<2x8xf32>
    %58 = arith.subf %4, %57 : vector<2x8xf32>
    %59 = vector.broadcast %48 : vector<2x1xf32> to vector<2x8xf32>
    %60 = arith.subf %6, %59 : vector<2x8xf32>
    %61 = vector.broadcast %50 : vector<2x1xf32> to vector<2x8xf32>
    %62 = arith.subf %8, %61 : vector<2x8xf32>
    %63 = vector.broadcast %52 : vector<2x1xf32> to vector<2x8xf32>
    %64 = arith.subf %4, %63 : vector<2x8xf32>
    %65 = vector.broadcast %54 : vector<2x1xf32> to vector<2x8xf32>
    %66 = arith.subf %6, %65 : vector<2x8xf32>
    %67 = vector.broadcast %56 : vector<2x1xf32> to vector<2x8xf32>
    %68 = arith.subf %8, %67 : vector<2x8xf32>
    %69 = vector.broadcast %10 : vector<2x1xf32> to vector<2x8xf32>
    %70 = arith.mulf %69, %58 : vector<2x8xf32>
    %71 = vector.broadcast %12 : vector<2x1xf32> to vector<2x8xf32>
    %72 = arith.mulf %71, %60 : vector<2x8xf32>
    %73 = arith.addf %70, %72 : vector<2x8xf32>
    %74 = vector.broadcast %14 : vector<2x1xf32> to vector<2x8xf32>
    %75 = arith.mulf %74, %62 : vector<2x8xf32>
    %76 = arith.addf %73, %75 : vector<2x8xf32>
    %77 = vector.broadcast %16 : vector<2x1xf32> to vector<2x8xf32>
    %78 = arith.mulf %77, %58 : vector<2x8xf32>
    %79 = vector.broadcast %18 : vector<2x1xf32> to vector<2x8xf32>
    %80 = arith.mulf %79, %60 : vector<2x8xf32>
    %81 = arith.addf %78, %80 : vector<2x8xf32>
    %82 = vector.broadcast %20 : vector<2x1xf32> to vector<2x8xf32>
    %83 = arith.mulf %82, %62 : vector<2x8xf32>
    %84 = arith.addf %81, %83 : vector<2x8xf32>
    %85 = vector.broadcast %22 : vector<2x1xf32> to vector<2x8xf32>
    %86 = arith.mulf %85, %58 : vector<2x8xf32>
    %87 = vector.broadcast %24 : vector<2x1xf32> to vector<2x8xf32>
    %88 = arith.mulf %87, %60 : vector<2x8xf32>
    %89 = arith.addf %86, %88 : vector<2x8xf32>
    %90 = vector.broadcast %26 : vector<2x1xf32> to vector<2x8xf32>
    %91 = arith.mulf %90, %62 : vector<2x8xf32>
    %92 = arith.addf %89, %91 : vector<2x8xf32>
    %93 = vector.broadcast %28 : vector<2x1xf32> to vector<2x8xf32>
    %94 = arith.mulf %93, %64 : vector<2x8xf32>
    %95 = vector.broadcast %30 : vector<2x1xf32> to vector<2x8xf32>
    %96 = arith.mulf %95, %66 : vector<2x8xf32>
    %97 = arith.addf %94, %96 : vector<2x8xf32>
    %98 = vector.broadcast %32 : vector<2x1xf32> to vector<2x8xf32>
    %99 = arith.mulf %98, %68 : vector<2x8xf32>
    %100 = arith.addf %97, %99 : vector<2x8xf32>
    %101 = vector.broadcast %34 : vector<2x1xf32> to vector<2x8xf32>
    %102 = arith.mulf %101, %64 : vector<2x8xf32>
    %103 = vector.broadcast %36 : vector<2x1xf32> to vector<2x8xf32>
    %104 = arith.mulf %103, %66 : vector<2x8xf32>
    %105 = arith.addf %102, %104 : vector<2x8xf32>
    %106 = vector.broadcast %38 : vector<2x1xf32> to vector<2x8xf32>
    %107 = arith.mulf %106, %68 : vector<2x8xf32>
    %108 = arith.addf %105, %107 : vector<2x8xf32>
    %109 = vector.broadcast %40 : vector<2x1xf32> to vector<2x8xf32>
    %110 = arith.mulf %109, %64 : vector<2x8xf32>
    %111 = vector.broadcast %42 : vector<2x1xf32> to vector<2x8xf32>
    %112 = arith.mulf %111, %66 : vector<2x8xf32>
    %113 = arith.addf %110, %112 : vector<2x8xf32>
    %114 = vector.broadcast %44 : vector<2x1xf32> to vector<2x8xf32>
    %115 = arith.mulf %114, %68 : vector<2x8xf32>
    %116 = arith.addf %113, %115 : vector<2x8xf32>
    %117 = tpu.reciprocal %92 : vector<2x8xf32> -> vector<2x8xf32>
    %118 = tpu.reciprocal %116 : vector<2x8xf32> -> vector<2x8xf32>
    %119 = arith.mulf %76, %117 : vector<2x8xf32>
    %120 = arith.mulf %100, %118 : vector<2x8xf32>
    %121 = arith.subf %119, %120 : vector<2x8xf32>
    %122 = math.absf %121 : vector<2x8xf32>
    %123 = arith.mulf %84, %117 : vector<2x8xf32>
    %124 = arith.mulf %108, %118 : vector<2x8xf32>
    %125 = arith.subf %123, %124 : vector<2x8xf32>
    %126 = math.absf %125 : vector<2x8xf32>
    %127 = arith.addf %122, %126 : vector<2x8xf32>
    %c0_58 = arith.constant 0 : index
    %c0_59 = arith.constant 0 : index
    %128 = vector.load %arg10[%c0_58, %c0_59] : memref<2x1xf32, #tpu.memory_space<vmem>>, vector<2x1xf32>
    %cst = arith.constant dense<0.000000e+00> : vector<2xf32>
    %129 = vector.multi_reduction <add>, %127, %cst [1] : vector<2x8xf32> to vector<2xf32>
    %130 = vector.shape_cast %129 : vector<2xf32> to vector<2x1xf32>
    %131 = arith.addf %128, %130 : vector<2x1xf32>
    %c0_60 = arith.constant 0 : index
    %c0_61 = arith.constant 0 : index
    %132 = vector.load %arg10[%c0_60, %c0_61] : memref<2x1xf32, #tpu.memory_space<vmem>>, vector<2x1xf32>
    tpu.vector_store %arg10[%c0_60, %c0_61], %131 {strides = array<i32>} : memref<2x1xf32, #tpu.memory_space<vmem>>, vector<2x1xf32>,
    %c0_i32_62 = arith.constant 0 : i32
    %133 = arith.cmpi eq, %arg1, %c0_i32_62 : i32
    %134 = arith.extui %133 : i1 to i32
    %c0_i32_63 = arith.constant 0 : i32
    %135 = arith.cmpi ne, %134, %c0_i32_63 : i32
    scf.if %135 {
      %c0_64 = arith.constant 0 : index
      %c0_65 = arith.constant 0 : index
      %136 = vector.load %arg10[%c0_64, %c0_65] : memref<2x1xf32, #tpu.memory_space<vmem>>, vector<2x1xf32>
      %cst_66 = arith.constant 1.250000e-01 : f32
      %137 = vector.broadcast %cst_66 : f32 to vector<2x1xf32>
      %138 = arith.mulf %136, %137 : vector<2x1xf32>
      %139 = arith.cmpf one, %138, %138 : vector<2x1xf32>
      %cst_67 = arith.constant 0.000000e+00 : f32
      %140 = vector.broadcast %cst_67 : f32 to vector<2x1xf32>
      %141 = arith.select %139, %140, %138 : vector<2x1xi1>, vector<2x1xf32>
      %cst_68 = arith.constant dense<0.000000e+00> : vector<1xf32>
      %142 = vector.multi_reduction <add>, %141, %cst_68 [0] : vector<2x1xf32> to vector<1xf32>
      %143 = vector.shape_cast %142 : vector<1xf32> to vector<1x1xf32>
      %c0_69 = arith.constant 0 : index
      %c0_70 = arith.constant 0 : index
      %144 = vector.load %arg2[%c0_69, %c0_70] : memref<2x3xf32, #tpu.memory_space<vmem>>, vector<2x3xf32>
      %c0_71 = arith.constant 0 : index
      %c0_72 = arith.constant 0 : index
      %145 = vector.load %arg4[%c0_71, %c0_72] : memref<2x3xf32, #tpu.memory_space<vmem>>, vector<2x3xf32>
      %146 = arith.subf %144, %145 : vector<2x3xf32>
      %147 = arith.mulf %146, %146 : vector<2x3xf32>
      %cst_73 = arith.constant dense<0.000000e+00> : vector<2xf32>
      %148 = vector.multi_reduction <add>, %147, %cst_73 [1] : vector<2x3xf32> to vector<2xf32>
      %149 = vector.shape_cast %148 : vector<2xf32> to vector<2x1xf32>
      %150 = math.sqrt %149 : vector<2x1xf32>
      %cst_74 = arith.constant dense<0.000000e+00> : vector<1xf32>
      %151 = vector.multi_reduction <add>, %150, %cst_74 [0] : vector<2x1xf32> to vector<1xf32>
      %152 = vector.shape_cast %151 : vector<1xf32> to vector<1x1xf32>
      %c0_75 = arith.constant 0 : index
      %c0_76 = arith.constant 0 : index
      %153 = vector.load %arg3[%c0_75, %c0_76] : memref<2x4xf32, #tpu.memory_space<vmem>>, vector<2x4xf32>
      %c0_77 = arith.constant 0 : index
      %c0_78 = arith.constant 0 : index
      %154 = vector.load %arg5[%c0_77, %c0_78] : memref<2x4xf32, #tpu.memory_space<vmem>>, vector<2x4xf32>
      %155 = arith.mulf %153, %153 : vector<2x4xf32>
      %cst_79 = arith.constant dense<0.000000e+00> : vector<2xf32>
      %156 = vector.multi_reduction <add>, %155, %cst_79 [1] : vector<2x4xf32> to vector<2xf32>
      %157 = vector.shape_cast %156 : vector<2xf32> to vector<2x1xf32>
      %158 = math.sqrt %157 : vector<2x1xf32>
      %cst_80 = arith.constant 9.99999996E-13 : f32
      %159 = vector.broadcast %cst_80 : f32 to vector<2x1xf32>
      %160 = arith.maximumf %158, %159 : vector<2x1xf32>
      %161 = vector.broadcast %160 : vector<2x1xf32> to vector<2x4xf32>
      %162 = arith.divf %153, %161 : vector<2x4xf32>
      %163 = vector.extract_strided_slice %162 {offsets = [0, 0], sizes = [2, 1], strides = [1, 1]} : vector<2x4xf32> to vector<2x1xf32>
      %164 = vector.extract_strided_slice %154 {offsets = [0, 0], sizes = [2, 1], strides = [1, 1]} : vector<2x4xf32> to vector<2x1xf32>
      %165 = arith.subf %163, %164 : vector<2x1xf32>
      %166 = vector.extract_strided_slice %162 {offsets = [0, 1], sizes = [2, 1], strides = [1, 1]} : vector<2x4xf32> to vector<2x1xf32>
      %cst_81 = arith.constant 0.000000e+00 : f32
      %167 = vector.broadcast %cst_81 : f32 to vector<2x1xf32>
      %168 = arith.subf %167, %166 : vector<2x1xf32>
      %169 = vector.extract_strided_slice %154 {offsets = [0, 1], sizes = [2, 1], strides = [1, 1]} : vector<2x4xf32> to vector<2x1xf32>
      %170 = arith.subf %168, %169 : vector<2x1xf32>
      %171 = vector.extract_strided_slice %162 {offsets = [0, 2], sizes = [2, 1], strides = [1, 1]} : vector<2x4xf32> to vector<2x1xf32>
      %cst_82 = arith.constant 0.000000e+00 : f32
      %172 = vector.broadcast %cst_82 : f32 to vector<2x1xf32>
      %173 = arith.subf %172, %171 : vector<2x1xf32>
      %174 = vector.extract_strided_slice %154 {offsets = [0, 2], sizes = [2, 1], strides = [1, 1]} : vector<2x4xf32> to vector<2x1xf32>
      %175 = arith.subf %173, %174 : vector<2x1xf32>
      %176 = vector.extract_strided_slice %162 {offsets = [0, 3], sizes = [2, 1], strides = [1, 1]} : vector<2x4xf32> to vector<2x1xf32>
      %cst_83 = arith.constant 0.000000e+00 : f32
      %177 = vector.broadcast %cst_83 : f32 to vector<2x1xf32>
      %178 = arith.subf %177, %176 : vector<2x1xf32>
      %179 = vector.extract_strided_slice %154 {offsets = [0, 3], sizes = [2, 1], strides = [1, 1]} : vector<2x4xf32> to vector<2x1xf32>
      %180 = arith.subf %178, %179 : vector<2x1xf32>
      %181 = arith.mulf %165, %165 : vector<2x1xf32>
      %182 = arith.mulf %170, %170 : vector<2x1xf32>
      %183 = arith.addf %181, %182 : vector<2x1xf32>
      %184 = arith.mulf %175, %175 : vector<2x1xf32>
      %185 = arith.addf %183, %184 : vector<2x1xf32>
      %186 = arith.mulf %180, %180 : vector<2x1xf32>
      %187 = arith.addf %185, %186 : vector<2x1xf32>
      %188 = math.sqrt %187 : vector<2x1xf32>
      %cst_84 = arith.constant dense<0.000000e+00> : vector<1xf32>
      %189 = vector.multi_reduction <add>, %188, %cst_84 [0] : vector<2x1xf32> to vector<1xf32>
      %190 = vector.shape_cast %189 : vector<1xf32> to vector<1x1xf32>
      %191 = tpu.iota {dimensions = array<i32: 2>} : vector<1x8x128xi32>
      %c0_i32_85 = arith.constant 0 : i32
      %192 = vector.broadcast %c0_i32_85 : i32 to vector<1x8x128xi32>
      %193 = arith.cmpi eq, %191, %192 : vector<1x8x128xi32>
      %c1_i32 = arith.constant 1 : i32
      %194 = vector.broadcast %c1_i32 : i32 to vector<1x8x128xi32>
      %195 = arith.cmpi eq, %191, %194 : vector<1x8x128xi32>
      %c2_i32 = arith.constant 2 : i32
      %196 = vector.broadcast %c2_i32 : i32 to vector<1x8x128xi32>
      %197 = arith.cmpi eq, %191, %196 : vector<1x8x128xi32>
      %cst_86 = arith.constant 0.000000e+00 : f32
      %198 = vector.shape_cast %190 : vector<1x1xf32> to vector<1x1x1xf32>
      %199 = vector.broadcast %198 : vector<1x1x1xf32> to vector<1x8x128xf32>
      %200 = vector.broadcast %cst_86 : f32 to vector<1x8x128xf32>
      %201 = arith.select %197, %199, %200 : vector<1x8x128xi1>, vector<1x8x128xf32>
      %202 = vector.shape_cast %152 : vector<1x1xf32> to vector<1x1x1xf32>
      %203 = vector.broadcast %202 : vector<1x1x1xf32> to vector<1x8x128xf32>
      %204 = arith.select %195, %203, %201 : vector<1x8x128xi1>, vector<1x8x128xf32>
      %205 = vector.shape_cast %143 : vector<1x1xf32> to vector<1x1x1xf32>
      %206 = vector.broadcast %205 : vector<1x1x1xf32> to vector<1x8x128xf32>
      %207 = arith.select %193, %206, %204 : vector<1x8x128xi1>, vector<1x8x128xf32>
      %c0_87 = arith.constant 0 : index
      %c0_88 = arith.constant 0 : index
      %c0_89 = arith.constant 0 : index
      %208 = vector.load %arg8[%c0_87, %c0_88, %c0_89] : memref<1x8x128xf32, #tpu.memory_space<vmem>>, vector<1x8x128xf32>
      tpu.vector_store %arg8[%c0_87, %c0_88, %c0_89], %207 {strides = array<i32>} : memref<1x8x128xf32, #tpu.memory_space<vmem>>, vector<1x8x128xf32>,
    } else {
    }
    return
  }
  func.func @transform_0(%arg0: i32, %arg1: i32) -> (i32, i32) {
    %c0_i32 = arith.constant 0 : i32
    %c0_i32_0 = arith.constant 0 : i32
    return %arg0, %c0_i32 : i32, i32
  }
  func.func @transform_1(%arg0: i32, %arg1: i32) -> (i32, i32) {
    %c0_i32 = arith.constant 0 : i32
    %c0_i32_0 = arith.constant 0 : i32
    return %arg0, %c0_i32 : i32, i32
  }
  func.func @transform_2(%arg0: i32, %arg1: i32) -> (i32, i32) {
    %c0_i32 = arith.constant 0 : i32
    %c0_i32_0 = arith.constant 0 : i32
    return %arg0, %c0_i32 : i32, i32
  }
  func.func @transform_3(%arg0: i32, %arg1: i32) -> (i32, i32) {
    %c0_i32 = arith.constant 0 : i32
    %c0_i32_0 = arith.constant 0 : i32
    return %arg0, %c0_i32 : i32, i32
  }
  func.func @transform_4(%arg0: i32, %arg1: i32) -> (i32, i32) {
    %c0_i32 = arith.constant 0 : i32
    %c0_i32_0 = arith.constant 0 : i32
    return %arg0, %c0_i32 : i32, i32
  }
  func.func @transform_5(%arg0: i32, %arg1: i32) -> (i32, i32, i32) {
    %c0_i32 = arith.constant 0 : i32
    %c0_i32_0 = arith.constant 0 : i32
    return %c0_i32, %arg0, %arg1 : i32, i32, i32
  }
  func.func @transform_6(%arg0: i32, %arg1: i32) -> (i32, i32, i32) {
    %c0_i32 = arith.constant 0 : i32
    %c0_i32_0 = arith.constant 0 : i32
    %c0_i32_1 = arith.constant 0 : i32
    return %arg0, %c0_i32, %c0_i32_0 : i32, i32, i32
  }
}

</mosaic_0001>

<bundles_post_ra>
// kernel: geometric_loss.1
= control target key start
LH: loop header
LB: loop body
LE: loop exit
PB: predicated region body
PF: predicated region fallthrough
CT: control target
= control target key end

     0   :  { %vm29_vm0 = vcmask 25600   ;;  %vm56_vm1 = vcmask 1024   ;;  %s592_s27 = smov 127   ;;  %s593_s28 = smov 125   ;;  %v598_v30 = vmov 0   ;;  %vm468_vm6 = vcmask 17408   ;;  %s761_s1 = inlined_call_operand.vmem [shape: f32[2,4], index: 1, kind: input, shape index: {}]   ;;  %s762_s0 = inlined_call_operand.vmem [shape: f32[2,3], index: 0, kind: input, shape index: {}]   ;;  %s763_s4 = inlined_call_operand.vmem [shape: f32[2,9], index: 4, kind: input, shape index: {}]   ;;  %s764_s2 = inlined_call_operand.vmem [shape: f32[2,3], index: 2, kind: input, shape index: {}]   ;;  %s765_s3 = inlined_call_operand.vmem [shape: f32[2,4], index: 3, kind: input, shape index: {}]   ;;  %s766_s5 = inlined_call_operand.vmem [shape: f32[3,2,8], index: 5, kind: input, shape index: {}]   ;;  %s767_s6 = inlined_call_operand.vmem [shape: f32[1,8,128], index: 6, kind: output, shape index: {}]  }
   0x1   :  { %v27_v0 = vld [vmem:[%s761_s1] sm:$0x3]  ;;  %s594_s7 = smov 122   ;;  %s595_s8 = smov 124   ;;  %573 = vset.pattern.permute.xlu0 %v598_v30  ;;  %574 = vset.pattern.permute.xlu1 %v598_v30  ;;  %vm443_vm7 = vcmask 58368   ;;  %vm479_vm13 = vcmask 1041408  }
   0x2   :  { %v28_v1 = vmul.f32 %v27_v0, %v27_v0  ;;  %v194_v3 = vld [vmem:[%s762_s0] sm:$0x3]  ;;  %s596_s9 = smov 1   ;;  %s597_s10 = smov 2  }
   0x3   :  { %v648_v4 = vld [vmem:[%s763_s4] sm:$0x3]  ;;  %197 = vst.msk [vmem:[#allocation2 + $0x24] sm:$0x3] %vm56_vm1, %v194_v3  ;;  %s591_s4 = smov 126   ;;  %s599_s11 = smov 121  }
   0x4   :  { %v30_v2 = vsel %vm29_vm0, %v28_v1, 0.0  ;;  %152 = vst.msk [vmem:[#allocation2 + $0x12] sm:$0x3] %vm56_vm1, %v648_v4  ;;  %v195_v16 = vld [vmem:[%s764_s2] sm:$0x3]  ;;  %s600_s12 = smov 120  }
   0x5   :  { %31 = vadd.xlane.f32.xlu0 %v30_v2  ;;  %199 = vst.msk [vmem:[#allocation2 + $0x2a] sm:$0x3] %vm56_vm1, %v195_v16  ;;  %s601_s13 = smov 123  }
   0xa   :  { %v264_v57 = vld [vmem:[#allocation2 + $0x24] sm:$0x3] }
   0xc   :  { %v270_v62 = vld [vmem:[#allocation2 + $0x2a] sm:$0x3] }
  0x92   :  { %v32_v5 = vpop.xlane.xlu0 %31 }
  0x93   :  { %575 = vrsqrt.f32 %v32_v5  ;;  %vm35_vm2 = vcmp.eq.f32.partialorder %v32_v5, inf  ;;  %v38_v8 = vand.u32 2147483648, %v32_v5  ;;  %vm37_vm3 = vcmp.eq.f32.partialorder %v32_v5, 0.0 }
  0x9d   :  { %v576_v6 = vpop.eup %575 }
  0x9e   :  { %v34_v7 = vmul.f32 %v576_v6, %v32_v5  ;;  %v711_v6 = vld [vmem:[%s761_s1] sm:$0x3] }
  0xa0   :  { %v36_v9 = vsel %vm35_vm2, %v32_v5, %v34_v7  ;;  %v246_v7 = vld [vmem:[#allocation2 + $0x12] sm:$0x3] }
  0xa1   :  { %v39_v10 = vsel %vm37_vm3, %v38_v8, %v36_v9  ;;  %v489_v8 = vmul.f32 %v711_v6, %v711_v6 }
  0xa2   :  { %v40_v11 = vmax.f32 %v39_v10, 1e-12 }
  0xa3   :  { %v491_v10 = vsel %vm29_vm0, %v489_v8, 0.0 }
  0xa4   :  { %577 = vrcp.f32 %v40_v11 }
  0xae   :  { %v578_v12 = vpop.eup %577 }
  0xaf   :  { %v42_v13 = vmul.f32 %v578_v12, %v27_v0 }
  0xb1   :  { %v653_v14 = vsub.f32 0.0, %v42_v13 }
  0xb3   :  { %79 = vrot.lane.b32.xlu1 %v653_v14, %s591_s4  ;;  %59 = vrot.lane.b32.xlu0 %v653_v14, %s592_s27  ;;  %v44_v15 = vmul.f32 %v653_v14, %v653_v14 }
  0xb7   :  { %63 = vrot.lane.b32.xlu1 %v653_v14, %s593_s28  ;;  %201 = vrot.lane.b32.xlu0 %v194_v3, %s592_s27 }
  0xbb   :  { %46 = vrot.lane.b32.xlu1 %v44_v15, %s592_s27  ;;  %179 = vrot.lane.b32.xlu0 %v648_v4, %s594_s7 }
  0xbf   :  { %212 = vrot.lane.b32.xlu0 %v194_v3, %s591_s4 }
  0xc3   :  { %154 = vrot.lane.b32.xlu0 %v648_v4, %s592_s27 }
  0xc7   :  { %169 = vrot.lane.b32.xlu0 %v648_v4, %s595_s8 }
 0x125   :  { %v80_v17 = vpop.permute.xlu1 %79  ;;  %v60_v18 = vpop.permute.xlu0 %59 }
 0x126   :  { %v83_v19 = vmul.f32 %v80_v17, %v42_v13  ;;  %v116_v22 = vmul.f32 %v60_v18, %v42_v13  ;;  %v82_v33 = vmul.f32 %v80_v17, %v653_v14  ;;  %v62_v40 = vmul.f32 %v60_v18, %v653_v14 }
 0x128   :  { %85 = vrot.lane.b32.xlu1 %v83_v19, %s596_s9 }
 0x129   :  { %v64_v20 = vpop.permute.xlu1 %63  ;;  %v202_v21 = vpop.permute.xlu0 %201 }
 0x12a   :  { %205 = vst.msk [vmem:[#allocation2 + $0x26] sm:$0x3] %vm56_vm1, %v202_v21  ;;  %v66_v28 = vmul.f32 %v64_v20, %v42_v13 }
 0x12c   :  { %118 = vrot.lane.b32.xlu1 %v116_v22, %s597_s10 }
 0x12d   :  { %v47_v23 = vpop.permute.xlu1 %46  ;;  %v180_v24 = vpop.permute.xlu0 %179 }
 0x12e   :  { %v49_v25 = vadd.f32 %v47_v23, %v44_v15  ;;  %183 = vst.msk [vmem:[#allocation2 + $0x1e] sm:$0x3] %vm56_vm1, %v180_v24 }
 0x130   :  { %v50_v26 = vmul.f32 2.0, %v49_v25  ;;  %104 = vrot.lane.b32.xlu1 %v44_v15, %s591_s4 }
 0x131   :  { %v213_v27 = vpop.permute.xlu0 %212  ;;  %v266_v60 = vld [vmem:[#allocation2 + $0x26] sm:$0x3] }
 0x132   :  { %v51_v29 = vsub.f32 1.0, %v50_v26  ;;  %216 = vst.msk [vmem:[#allocation2 + $0x28] sm:$0x3] %vm56_vm1, %v213_v27 }
 0x134   :  { %68 = vrot.lane.b32.xlu1 %v66_v28, %s596_s9  ;;  %145 = vrot.lane.b32.xlu0 %v51_v29, %s592_s27 }
 0x135   :  { %v155_v31 = vpop.permute.xlu0 %154  ;;  %v258_v12 = vld [vmem:[#allocation2 + $0x1e] sm:$0x3] }
 0x136   :  { %158 = vst.msk [vmem:[#allocation2 + $0x14] sm:$0x3] %vm56_vm1, %v155_v31 }
 0x138   :  { %53 = vrot.lane.b32.xlu0 %v51_v29, %s591_s4  ;;  %207 = vrot.lane.b32.xlu1 %v195_v16, %s592_s27 }
 0x139   :  { %v170_v32 = vpop.permute.xlu0 %169  ;;  %v268_v2 = vld [vmem:[#allocation2 + $0x28] sm:$0x3] }
 0x13a   :  { %173 = vst.msk [vmem:[#allocation2 + $0x1a] sm:$0x3] %vm56_vm1, %v170_v32 }
 0x13c   :  { %184 = vrot.lane.b32.xlu1 %v648_v4, %s599_s11 }
 0x13d   :  { %v248_v13 = vld [vmem:[#allocation2 + $0x14] sm:$0x3] }
 0x140   :  { %217 = vrot.lane.b32.xlu1 %v195_v16, %s591_s4 }
 0x141   :  { %v254_v24 = vld [vmem:[#allocation2 + $0x1a] sm:$0x3] }
 0x144   :  { %189 = vrot.lane.b32.xlu1 %v648_v4, %s600_s12 }
 0x148   :  { %164 = vrot.lane.b32.xlu1 %v648_v4, %s593_s28 }
 0x14c   :  { %159 = vrot.lane.b32.xlu1 %v648_v4, %s591_s4 }
 0x19a   :  { %v86_v34 = vpop.permute.xlu1 %85 }
 0x19b   :  { %v129_v35 = vsub.f32 %v82_v33, %v86_v34  ;;  %v88_v55 = vadd.f32 %v86_v34, %v82_v33  ;;  %v464_v33 = vld [vmem:[%s762_s0] sm:$0x3] }
 0x19c   :  { %v465_v34 = vld [vmem:[%s764_s2] sm:$0x3] }
 0x19d   :  { %v130_v36 = vmul.f32 2.0, %v129_v35  ;;  %v89_v59 = vmul.f32 2.0, %v88_v55  ;;  %v730_v35 = vsub.f32 %v464_v33, %v465_v34 }
 0x19e   :  { %v119_v37 = vpop.permute.xlu1 %118 }
 0x19f   :  { %132 = vrot.lane.b32.xlu0 %v130_v36, %s592_s27  ;;  %v137_v44 = vadd.f32 %v119_v37, %v62_v40  ;;  %v121_v47 = vsub.f32 %v62_v40, %v119_v37 }
 0x1a1   :  { %v138_v51 = vmul.f32 2.0, %v137_v44  ;;  %v122_v53 = vmul.f32 2.0, %v121_v47 }
 0x1a2   :  { %v105_v38 = vpop.permute.xlu1 %104 }
 0x1a3   :  { %v107_v39 = vadd.f32 %v105_v38, %v44_v15  ;;  %174 = vrot.lane.b32.xlu0 %v648_v4, %s601_s13 }
 0x1a5   :  { %v108_v41 = vmul.f32 2.0, %v107_v39 }
 0x1a6   :  { %v69_v42 = vpop.permute.xlu1 %68  ;;  %v146_v43 = vpop.permute.xlu0 %145 }
 0x1a7   :  { %v109_v45 = vsub.f32 1.0, %v108_v41  ;;  %v96_v46 = vadd.f32 %v69_v42, %v62_v40  ;;  %149 = vst.msk [vmem:[#allocation2 + $0x10] sm:$0x3] %vm56_vm1, %v146_v43  ;;  %v71_v52 = vsub.f32 %v62_v40, %v69_v42 }
 0x1a9   :  { %v97_v48 = vmul.f32 2.0, %v96_v46  ;;  %111 = vrot.lane.b32.xlu1 %v109_v45, %s592_s27  ;;  %v72_v56 = vmul.f32 2.0, %v71_v52 }
 0x1aa   :  { %v54_v49 = vpop.permute.xlu0 %53  ;;  %v208_v50 = vpop.permute.xlu1 %207 }
 0x1ab   :  { %57 = vst.msk [vmem:[#allocation2] sm:$0x3] %vm56_vm1, %v54_v49  ;;  %99 = vrot.lane.b32.xlu0 %v97_v48, %s592_s27  ;;  %211 = vst.msk [vmem:[#allocation2 + $0x2c] sm:$0x3] %vm56_vm1, %v208_v50 }
 0x1ad   :  { %140 = vrot.lane.b32.xlu1 %v138_v51, %s591_s4  ;;  %v488_v51 = vld [vmem:[%s765_s3] sm:$0x3] }
 0x1ae   :  { %v185_v54 = vpop.permute.xlu1 %184  ;;  %v244_v9 = vld [vmem:[#allocation2 + $0x10] sm:$0x3] }
 0x1af   :  { %124 = vrot.lane.b32.xlu0 %v122_v53, %s591_s4  ;;  %188 = vst.msk [vmem:[#allocation2 + $0x20] sm:$0x3] %vm56_vm1, %v185_v54 }
 0x1b1   :  { %74 = vrot.lane.b32.xlu1 %v72_v56, %s592_s27 }
 0x1b2   :  { %v218_v58 = vpop.permute.xlu1 %217  ;;  %v272_v0 = vld [vmem:[#allocation2 + $0x2c] sm:$0x3]  ;;  %v228_v11 = vld [vmem:[#allocation2] sm:$0x3] }
 0x1b3   :  { %277 = vperm.xlu0 %573, %v264_v57   ;;  %221 = vst.msk [vmem:[#allocation2 + $0x2e] sm:$0x3] %vm56_vm1, %v218_v58 }
 0x1b5   :  { %91 = vrot.lane.b32.xlu1 %v89_v59, %s592_s27 }
 0x1b6   :  { %v190_v61 = vpop.permute.xlu1 %189  ;;  %v260_v4 = vld [vmem:[#allocation2 + $0x20] sm:$0x3] }
 0x1b7   :  { %283 = vperm.xlu0 %573, %v266_v60   ;;  %193 = vst.msk [vmem:[#allocation2 + $0x22] sm:$0x3] %vm56_vm1, %v190_v61  ;;  %v559_v61 = vld [vmem:[%s766_s5 + $0x2] sm:$0x3] }
 0x1ba   :  { %v165_v63 = vpop.permute.xlu1 %164  ;;  %v274_v3 = vld [vmem:[#allocation2 + $0x2e] sm:$0x3] }
 0x1bb   :  { %295 = vperm.xlu0 %573, %v270_v62   ;;  %168 = vst.msk [vmem:[#allocation2 + $0x18] sm:$0x3] %vm56_vm1, %v165_v63  ;;  %v223_v62 = vld [vmem:[%s766_s5] sm:$0x3] }
 0x1be   :  { %v160_v1 = vpop.permute.xlu1 %159  ;;  %v262_v5 = vld [vmem:[#allocation2 + $0x22] sm:$0x3] }
 0x1bf   :  { %301 = vperm.xlu0 %573, %v272_v0   ;;  %163 = vst.msk [vmem:[#allocation2 + $0x16] sm:$0x3] %vm56_vm1, %v160_v1 }
 0x1c2   :  { %v252_v27 = vld [vmem:[#allocation2 + $0x18] sm:$0x3] }
 0x1c3   :  { %289 = vperm.xlu0 %573, %v268_v2  }
 0x1c6   :  { %v250_v32 = vld [vmem:[#allocation2 + $0x16] sm:$0x3] }
 0x1c7   :  { %307 = vperm.xlu0 %573, %v274_v3   ;;  %v560_v3 = vld [vmem:[%s766_s5 + $0x4] sm:$0x3] }
 0x1cb   :  { %419 = vperm.xlu0 %573, %v260_v4  }
 0x1cf   :  { %426 = vperm.xlu0 %573, %v262_v5  }
 0x1d3   :  { %373 = vperm.xlu0 %573, %v246_v7  }
 0x1d7   :  { %366 = vperm.xlu0 %573, %v244_v9  }
 0x1d9   :  { %492 = vadd.xlane.f32.xlu1 %v491_v10 }
 0x1db   :  { %313 = vperm.xlu0 %573, %v228_v11   ;;  %v602_v11 = vmov 0.0  }
 0x1dc   :  { %222 = vst.msk [vmem:[#allocation3] sm:$0x3] %vm56_vm1, %v602_v11 }
 0x1ea   :  { %413 = vperm.xlu1 %574, %v258_v12  }
 0x1ee   :  { %379 = vperm.xlu1 %574, %v248_v13  }
 0x211   :  { %v133_v14 = vpop.permute.xlu0 %132 }
 0x212   :  { %136 = vst.msk [vmem:[#allocation2 + $0xc] sm:$0x3] %vm56_vm1, %v133_v14 }
 0x215   :  { %v175_v15 = vpop.permute.xlu0 %174 }
 0x216   :  { %178 = vst.msk [vmem:[#allocation2 + $0x1c] sm:$0x3] %vm56_vm1, %v175_v15 }
 0x219   :  { %v240_v16 = vld [vmem:[#allocation2 + $0xc] sm:$0x3] }
 0x21a   :  { %353 = vperm.xlu0 %573, %v240_v16  }
 0x21b   :  { %v112_v17 = vpop.permute.xlu1 %111 }
 0x21c   :  { %115 = vst.msk [vmem:[#allocation2 + $0x8] sm:$0x3] %vm56_vm1, %v112_v17 }
 0x21d   :  { %v100_v18 = vpop.permute.xlu0 %99  ;;  %v256_v30 = vld [vmem:[#allocation2 + $0x1c] sm:$0x3] }
 0x21e   :  { %103 = vst.msk [vmem:[#allocation2 + $0x6] sm:$0x3] %vm56_vm1, %v100_v18 }
 0x21f   :  { %v141_v19 = vpop.permute.xlu1 %140 }
 0x220   :  { %144 = vst.msk [vmem:[#allocation2 + $0xe] sm:$0x3] %vm56_vm1, %v141_v19 }
 0x221   :  { %v125_v20 = vpop.permute.xlu0 %124 }
 0x222   :  { %128 = vst.msk [vmem:[#allocation2 + $0xa] sm:$0x3] %vm56_vm1, %v125_v20 }
 0x223   :  { %v75_v21 = vpop.permute.xlu1 %74  ;;  %v236_v22 = vld [vmem:[#allocation2 + $0x8] sm:$0x3] }
 0x224   :  { %78 = vst.msk [vmem:[#allocation2 + $0x2] sm:$0x3] %vm56_vm1, %v75_v21  ;;  %339 = vperm.xlu1 %574, %v236_v22  }
 0x225   :  { %v234_v29 = vld [vmem:[#allocation2 + $0x6] sm:$0x3] }
 0x227   :  { %v92_v23 = vpop.permute.xlu1 %91  ;;  %v242_v25 = vld [vmem:[#allocation2 + $0xe] sm:$0x3] }
 0x228   :  { %95 = vst.msk [vmem:[#allocation2 + $0x4] sm:$0x3] %vm56_vm1, %v92_v23  ;;  %399 = vperm.xlu1 %574, %v254_v24   ;;  %359 = vperm.xlu0 %573, %v242_v25  }
 0x229   :  { %v238_v28 = vld [vmem:[#allocation2 + $0xa] sm:$0x3] }
 0x22b   :  { %v230_v26 = vld [vmem:[#allocation2 + $0x2] sm:$0x3] }
 0x22c   :  { %319 = vperm.xlu1 %574, %v230_v26   ;;  %393 = vperm.xlu0 %573, %v252_v27   ;;  %v467_v27 = vmul.f32 %v730_v35, %v730_v35 }
 0x22f   :  { %v232_v31 = vld [vmem:[#allocation2 + $0x4] sm:$0x3] }
 0x230   :  { %346 = vperm.xlu1 %574, %v238_v28   ;;  %333 = vperm.xlu0 %573, %v234_v29  }
 0x232   :  { %v278_v36 = vpop.permute.xlu0 %277 }
 0x233   :  { %v280_v12 = vsub.f32 %v223_v62, %v278_v36 }
 0x234   :  { %406 = vperm.xlu1 %574, %v256_v30   ;;  %326 = vperm.xlu0 %573, %v232_v31  }
 0x236   :  { %v284_v38 = vpop.permute.xlu0 %283 }
 0x237   :  { %v286_v13 = vsub.f32 %v559_v61, %v284_v38 }
 0x238   :  { %386 = vperm.xlu0 %573, %v250_v32  }
 0x23a   :  { %v296_v39 = vpop.permute.xlu0 %295 }
 0x23b   :  { %v298_v63 = vsub.f32 %v223_v62, %v296_v39  ;;  %v469_v39 = vsel %vm468_vm6, %v467_v27, 0.0 }
 0x23e   :  { %v302_v44 = vpop.permute.xlu0 %301 }
 0x23f   :  { %v304_v0 = vsub.f32 %v559_v61, %v302_v44 }
 0x242   :  { %v290_v47 = vpop.permute.xlu0 %289 }
 0x243   :  { %v292_v14 = vsub.f32 %v560_v3, %v290_v47 }
 0x246   :  { %v308_v48 = vpop.permute.xlu0 %307 }
 0x247   :  { %v310_v4 = vsub.f32 %v560_v3, %v308_v48 }
 0x24a   :  { %v420_v54 = vpop.permute.xlu0 %419 }
 0x24b   :  { %v422_v5 = vmul.f32 %v420_v54, %v304_v0 }
 0x24e   :  { %v427_v57 = vpop.permute.xlu0 %426 }
 0x24f   :  { %v429_v9 = vmul.f32 %v427_v57, %v310_v4 }
 0x252   :  { %v374_v58 = vpop.permute.xlu0 %373 }
 0x253   :  { %v376_v33 = vmul.f32 %v374_v58, %v298_v63 }
 0x256   :  { %v367_v59 = vpop.permute.xlu0 %366 }
 0x257   :  { %v369_v20 = vmul.f32 %v367_v59, %v292_v14 }
 0x25a   :  { %v314_v1 = vpop.permute.xlu0 %313 }
 0x25b   :  { %v316_v34 = vmul.f32 %v314_v1, %v280_v12 }
 0x266   :  { %v493_v37 = vpop.xlane.xlu1 %492 }
 0x267   :  { %579 = vrsqrt.f32 %v493_v37  ;;  %vm496_vm4 = vcmp.eq.f32.partialorder %v493_v37, inf  ;;  %v499_v41 = vand.u32 2147483648, %v493_v37  ;;  %vm498_vm5 = vcmp.eq.f32.partialorder %v493_v37, 0.0 }
 0x26a   :  { %v414_v60 = vpop.permute.xlu1 %413 }
 0x26e   :  { %v380_v2 = vpop.permute.xlu1 %379 }
 0x271   :  { %v580_v40 = vpop.eup %579 }
 0x272   :  { %v495_v42 = vmul.f32 %v580_v40, %v493_v37  ;;  %v382_v40 = vmul.f32 %v380_v2, %v304_v0 }
 0x274   :  { %v497_v43 = vsel %vm496_vm4, %v493_v37, %v495_v42 }
 0x275   :  { %v500_v45 = vsel %vm498_vm5, %v499_v41, %v497_v43 }
 0x276   :  { %v501_v46 = vmax.f32 %v500_v45, 1e-12 }
 0x278   :  { %581 = vrcp.f32 %v501_v46 }
 0x282   :  { %v582_v49 = vpop.eup %581 }
 0x283   :  { %v503_v50 = vmul.f32 %v582_v49, %v711_v6  ;;  %v416_v6 = vmul.f32 %v414_v60, %v298_v63 }
 0x285   :  { %v505_v52 = vsub.f32 0.0, %v503_v50  ;;  %v736_v53 = vsub.f32 %v503_v50, %v488_v51  ;;  %v423_v10 = vadd.f32 %v422_v5, %v416_v6  ;;  %v383_v50 = vadd.f32 %v382_v40, %v376_v33 }
 0x287   :  { %v506_v55 = vsub.f32 %v505_v52, %v488_v51  ;;  %v430_v19 = vadd.f32 %v429_v9, %v423_v10  ;;  %v507_v2 = vmul.f32 %v736_v53, %v736_v53 }
 0x289   :  { %v508_v56 = vmul.f32 %v506_v55, %v506_v55  ;;  %583 = vrcp.f32 %v430_v19  ;;  %v442_v19 = vld [vmem:[#allocation3] sm:$0x3] }
 0x28b   :  { %510 = vrot.lane.b32.xlu1 %v508_v56, %s592_s27 }
 0x28f   :  { %514 = vrot.lane.b32.xlu1 %v508_v56, %s591_s4 }
 0x293   :  { %518 = vrot.lane.b32.xlu1 %v508_v56, %s593_s28  ;;  %v584_v35 = vpop.eup %583 }
 0x299   :  { %v354_v7 = vpop.permute.xlu0 %353 }
 0x29a   :  { %v356_v17 = vmul.f32 %v354_v7, %v280_v12 }
 0x2a3   :  { %v340_v8 = vpop.permute.xlu1 %339 }
 0x2a4   :  { %v342_v30 = vmul.f32 %v340_v8, %v286_v13 }
 0x2a7   :  { %v400_v15 = vpop.permute.xlu1 %399  ;;  %v360_v16 = vpop.permute.xlu0 %359 }
 0x2a8   :  { %v362_v18 = vmul.f32 %v360_v16, %v286_v13  ;;  %v402_v31 = vmul.f32 %v400_v15, %v304_v0 }
 0x2aa   :  { %v363_v21 = vadd.f32 %v362_v18, %v356_v17 }
 0x2ab   :  { %v320_v22 = vpop.permute.xlu1 %319  ;;  %v394_v23 = vpop.permute.xlu0 %393 }
 0x2ac   :  { %v370_v24 = vadd.f32 %v369_v20, %v363_v21  ;;  %v396_v28 = vmul.f32 %v394_v23, %v298_v63  ;;  %v322_v32 = vmul.f32 %v320_v22, %v286_v13 }
 0x2ae   :  { %585 = vrcp.f32 %v370_v24  ;;  %v403_v41 = vadd.f32 %v402_v31, %v396_v28  ;;  %v323_v45 = vadd.f32 %v322_v32, %v316_v34 }
 0x2af   :  { %v347_v25 = vpop.permute.xlu1 %346  ;;  %v334_v26 = vpop.permute.xlu0 %333 }
 0x2b0   :  { %v336_v29 = vmul.f32 %v334_v26, %v280_v12  ;;  %v349_v44 = vmul.f32 %v347_v25, %v292_v14 }
 0x2b2   :  { %v343_v36 = vadd.f32 %v342_v30, %v336_v29 }
 0x2b3   :  { %v407_v37 = vpop.permute.xlu1 %406  ;;  %v327_v38 = vpop.permute.xlu0 %326 }
 0x2b4   :  { %v409_v42 = vmul.f32 %v407_v37, %v310_v4  ;;  %v329_v43 = vmul.f32 %v327_v38, %v292_v14  ;;  %v350_v47 = vadd.f32 %v349_v44, %v343_v36 }
 0x2b6   :  { %v410_v46 = vadd.f32 %v409_v42, %v403_v41  ;;  %v330_v52 = vadd.f32 %v329_v43, %v323_v45  ;;  %v536_v43 = vlaneseq }
 0x2b7   :  { %v387_v48 = vpop.permute.xlu0 %386  ;;  %470 = vadd.xlane.f32.xlu1 %v469_v39 }
 0x2b8   :  { %v586_v49 = vpop.eup %585  ;;  %v438_v51 = vmul.f32 %v584_v35, %v410_v46  ;;  %v389_v54 = vmul.f32 %v387_v48, %v310_v4  ;;  %v537_v45 = vand.u32 127, %v536_v43 }
 0x2b9   :  { %v437_v55 = vmul.f32 %v586_v49, %v350_v47  ;;  %v433_v57 = vmul.f32 %v586_v49, %v330_v52 }
 0x2ba   :  { %v390_v56 = vadd.f32 %v389_v54, %v383_v50  ;;  %vm540_vm14 = vcmp.eq.s32.totalorder %v537_v45, 2  ;;  %vm539_vm15 = vcmp.eq.s32.totalorder %v537_v45, 1  ;;  %vm538_vm0 = vcmp.eq.s32.totalorder %v537_v45, 0 }
 0x2bb   :  { %v439_v59 = vsub.f32 %v437_v55, %v438_v51 }
 0x2bc   :  { %v434_v58 = vmul.f32 %v584_v35, %v390_v56 }
 0x2bd   :  { %v440_v62 = vand.u32 2147483647, %v439_v59 }
 0x2be   :  { %v435_v60 = vsub.f32 %v433_v57, %v434_v58 }
 0x2c0   :  { %v436_v61 = vand.u32 2147483647, %v435_v60 }
 0x2c2   :  { %v441_v63 = vadd.f32 %v440_v62, %v436_v61 }
 0x2c4   :  { %v444_v0 = vsel %vm443_vm7, %v441_v63, 0.0 }
 0x2c5   :  { %445 = vadd.xlane.f32.xlu0 %v444_v0 }
 0x2fd   :  { %v511_v1 = vpop.permute.xlu1 %510 }
 0x2fe   :  { %v513_v5 = vadd.f32 %v511_v1, %v507_v2 }
 0x301   :  { %v515_v3 = vpop.permute.xlu1 %514 }
 0x302   :  { %v517_v6 = vadd.f32 %v515_v3, %v513_v5 }
 0x305   :  { %v519_v4 = vpop.permute.xlu1 %518 }
 0x306   :  { %v521_v7 = vadd.f32 %v519_v4, %v517_v6 }
 0x308   :  { %587 = vrsqrt.f32 %v521_v7  ;;  %vm524_vm8 = vcmp.eq.f32.partialorder %v521_v7, inf  ;;  %v527_v10 = vand.u32 2147483648, %v521_v7  ;;  %vm526_vm9 = vcmp.eq.f32.partialorder %v521_v7, 0.0 }
 0x312   :  { %v588_v8 = vpop.eup %587 }
 0x313   :  { %v523_v9 = vmul.f32 %v588_v8, %v521_v7 }
 0x315   :  { %v525_v11 = vsel %vm524_vm8, %v521_v7, %v523_v9 }
 0x316   :  { %v528_v12 = vsel %vm526_vm9, %v527_v10, %v525_v11 }
 0x317   :  { %v529_v13 = vsel %vm56_vm1, %v528_v12, 0.0 }
 0x318   :  { %v530_v14 = vrot.slane %v529_v13, 4 }
 0x31a   :  { %v531_v15 = vadd.f32 %v530_v14, %v529_v13 }
 0x31c   :  { %v532_v16 = vrot.slane %v531_v15, 2 }
 0x31e   :  { %v533_v17 = vadd.f32 %v532_v16, %v531_v15 }
 0x320   :  { %v534_v53 = vrot.slane %v533_v17, 1 }
 0x322   :  { %v535_v18 = vadd.f32 %v534_v53, %v533_v17 }
 0x324   :  { %543 = vperm.xlu0 %573, %v535_v18  }
 0x344   :  { %v471_v32 = vpop.xlane.xlu1 %470 }
 0x345   :  { %589 = vrsqrt.f32 %v471_v32  ;;  %vm474_vm11 = vcmp.eq.f32.partialorder %v471_v32, inf  ;;  %v477_v36 = vand.u32 2147483648, %v471_v32  ;;  %vm476_vm12 = vcmp.eq.f32.partialorder %v471_v32, 0.0 }
 0x34f   :  { %v590_v33 = vpop.eup %589 }
 0x350   :  { %v473_v34 = vmul.f32 %v590_v33, %v471_v32 }
 0x352   :  { %v446_v20 = vpop.xlane.xlu0 %445  ;;  %v475_v37 = vsel %vm474_vm11, %v471_v32, %v473_v34 }
 0x353   :  { %v447_v21 = vadd.f32 %v446_v20, %v442_v19  ;;  %v478_v38 = vsel %vm476_vm12, %v477_v36, %v475_v37 }
 0x354   :  { %v480_v39 = vsel %vm479_vm13, %v478_v38, 0.0 }
 0x355   :  { %449 = vst.msk [vmem:[#allocation3] sm:$0x3] %vm56_vm1, %v447_v21  ;;  %v481_v40 = vrot.slane %v480_v39, 4 }
 0x357   :  { %v482_v41 = vadd.f32 %v481_v40, %v480_v39 }
 0x359   :  { %v483_v42 = vrot.slane %v482_v41, 2 }
 0x35b   :  { %v484_v44 = vadd.f32 %v483_v42, %v482_v41 }
 0x35c   :  { %v453_v22 = vld [vmem:[#allocation3] sm:$0x3] }
 0x35d   :  { %v454_v23 = vmul.f32 0.125, %v453_v22  ;;  %v485_v46 = vrot.slane %v484_v44, 1 }
 0x35f   :  { %vm455_vm10 = vcmp.ne.f32.partialorder %v454_v23, %v454_v23  ;;  %v486_v47 = vadd.f32 %v485_v46, %v484_v44 }
 0x360   :  { %v456_v24 = vsel %vm455_vm10, 0.0, %v454_v23 }
 0x361   :  { %v457_v25 = vsel %vm56_vm1, %v456_v24, 0.0 }
 0x362   :  { %v458_v26 = vrot.slane %v457_v25, 4 }
 0x364   :  { %v459_v27 = vadd.f32 %v458_v26, %v457_v25 }
 0x366   :  { %v460_v28 = vrot.slane %v459_v27, 2 }
 0x368   :  { %v461_v29 = vadd.f32 %v460_v28, %v459_v27 }
 0x36a   :  { %v462_v30 = vrot.slane %v461_v29, 1 }
 0x36c   :  { %v463_v31 = vadd.f32 %v462_v30, %v461_v29 }
 0x36e   :  { %550 = vperm.xlu1 %574, %v463_v31  }
 0x3a3   :  { %v544_v35 = vpop.permute.xlu0 %543 }
 0x3a4   :  { %v546_v48 = vsel %vm540_vm14, %v544_v35, 0.0 }
 0x3a5   :  { %v547_v49 = vsel %vm539_vm15, %v486_v47, %v546_v48 }
 0x3ed   :  { %v551_v50 = vpop.permute.xlu1 %550 }
 0x3ee   :  { %v553_v51 = vsel %vm538_vm0, %v551_v50, %v547_v49 }
 0x3ef   :  { %554 = vst [vmem:[%s767_s6] sm:$0xff] %v553_v51 }

</bundles_post_ra>
